<compile_context>
chip_gen: v7x
topology: tpu7x:2x2x1
jax: 0.10.0
libtpu: 0.0.40
codegen_flags: <defaults>
</compile_context>

<pallas_src>
import jax
import jax.numpy as jnp
from jax.experimental import pallas as pl
from jax.experimental.pallas import tpu as pltpu


def _rnn_lltm_kernel(xh_ref, w1_ref, b1_ref, c0_ref, w2_ref, b2_ref, out_ref):
    # xh_ref: (Bp, Kp)  concat([h0, x]) zero-padded
    # w1_ref: (Kp, 3H)  LLTM weights, transposed + zero-padded rows
    # b1_ref: (1, 3H)   LLTM bias
    # c0_ref: (Bp, H)   old cell state
    # w2_ref: (H, Cp)   classifier weights, transposed + zero-padded cols
    # b2_ref: (1, Cp)   classifier bias (zero-padded)
    # out_ref:(Bp, Cp)  lane-dense classifier output
    H = c0_ref.shape[1]

    # LLTM gate GEMM on the MXU, f32 accumulation.
    gates = jnp.dot(xh_ref[...], w1_ref[...],
                    preferred_element_type=jnp.float32) + b1_ref[...]

    g_i = gates[:, 0 * H:1 * H]
    g_o = gates[:, 1 * H:2 * H]
    g_c = gates[:, 2 * H:3 * H]

    input_gate = jax.nn.sigmoid(g_i)
    output_gate = jax.nn.sigmoid(g_o)
    candidate = jnp.where(g_c > 0, g_c, jnp.exp(g_c) - 1.0)   # ELU(alpha=1)

    new_cell = c0_ref[...] + candidate * input_gate
    new_h = jnp.tanh(new_cell) * output_gate

    # Classifier GEMM, lane-dense (Bp, Cp) output slab.
    out_ref[...] = (jnp.dot(new_h, w2_ref[...],
                            preferred_element_type=jnp.float32)
                    + b2_ref[...]).astype(out_ref.dtype)


def _round_up(v, m):
    return ((v + m - 1) // m) * m


@jax.jit
def rnn_lltm_forward(x, h0, c0, lltm_w, lltm_b, clf_w, clf_b):
    """Forward of RnnLLTM.

    x:      (B, D)          float32
    h0, c0: (B, H)          float32 (initial LLTM state)
    lltm_w: (3H, D + H)     float32 (PyTorch layout: F.linear weight)
    lltm_b: (1, 3H)         float32
    clf_w:  (n_class, H)    float32
    clf_b:  (n_class,)      float32
    returns (B, n_class)    float32
    """
    B, D = x.shape
    H = h0.shape[1]
    G = 3 * H
    C = clf_w.shape[0]

    Bp = _round_up(B, 8)        # sublane-aligned batch
    K = H + D
    Kp = _round_up(K, 128)      # lane-aligned contraction dim (912 -> 1024)
    Cp = _round_up(C, 128)      # lane-dense classifier output (10 -> 128)

    # Layout prep (pure data movement, tiny vs. the fused kernel).
    xh = jnp.concatenate([h0, x], axis=1)                    # (B, K)
    xh = jnp.pad(xh, ((0, Bp - B), (0, Kp - K)))             # (Bp, Kp)
    c0p = jnp.pad(c0, ((0, Bp - B), (0, 0)))                 # (Bp, H)
    w1 = jnp.pad(lltm_w.T, ((0, Kp - K), (0, 0)))            # (Kp, 3H)
    b1 = lltm_b.reshape(1, G)
    w2 = jnp.pad(clf_w.T, ((0, 0), (0, Cp - C)))             # (H, Cp)
    b2 = jnp.pad(clf_b.reshape(1, C), ((0, 0), (0, Cp - C)))

    vmem = pl.BlockSpec(memory_space=pltpu.MemorySpace.VMEM)
    out = pl.pallas_call(
        _rnn_lltm_kernel,
        out_shape=jax.ShapeDtypeStruct((Bp, Cp), jnp.float32),
        in_specs=[vmem] * 6,
        out_specs=vmem,
    )(xh, w1, b1, c0p, w2, b2)

    return out[:B, :C]


if __name__ == "__main__":
    # Shapes implied by the module defaults: in_dim=784, hidden=128, n_class=10, batch=1.
    batch_size = 1
    in_dim = 28 * 28
    hidden_dim = 128
    n_class = 10

    key = jax.random.PRNGKey(0)
    kx, kw, kb, kcw, kcb = jax.random.split(key, 5)

    x = jax.random.normal(kx, (batch_size, in_dim), dtype=jnp.float32)

    # LLTM params: uniform(-stdv, +stdv), stdv = 1/sqrt(state_size) (reset_parameters).
    stdv = 1.0 / (hidden_dim ** 0.5)
    lltm_w = jax.random.uniform(kw, (3 * hidden_dim, in_dim + hidden_dim),
                                jnp.float32, -stdv, stdv)
    lltm_b = jax.random.uniform(kb, (1, 3 * hidden_dim), jnp.float32, -stdv, stdv)

    # Classifier (nn.Linear(hidden_dim, n_class)) default-style init.
    cb = 1.0 / (hidden_dim ** 0.5)
    clf_w = jax.random.uniform(kcw, (n_class, hidden_dim), jnp.float32, -cb, cb)
    clf_b = jax.random.uniform(kcb, (n_class,), jnp.float32, -cb, cb)

    # Initial state registered by the module: zeros.
    h0 = jnp.zeros((batch_size, hidden_dim), jnp.float32)
    c0 = jnp.zeros((batch_size, hidden_dim), jnp.float32)

    out = rnn_lltm_forward(x, h0, c0, lltm_w, lltm_b, clf_w, clf_b)
    out = jax.block_until_ready(out)

    # Pure-JAX reference (same math as the PyTorch module).
    X = jnp.concatenate([h0, x], axis=1)
    gates = X @ lltm_w.T + lltm_b
    i_g = jax.nn.sigmoid(gates[:, :hidden_dim])
    o_g = jax.nn.sigmoid(gates[:, hidden_dim:2 * hidden_dim])
    c_g = gates[:, 2 * hidden_dim:]
    cand = jnp.where(c_g > 0, c_g, jnp.exp(c_g) - 1.0)
    new_c = c0 + cand * i_g
    new_h = jnp.tanh(new_c) * o_g
    ref = new_h @ clf_w.T + clf_b

    assert out.shape == (batch_size, n_class)
    assert jnp.allclose(out, ref, atol=1e-4, rtol=1e-4)

    print("KERNEL_OK")
</pallas_src>

<mosaic_0001>
module attributes {stable_mosaic.version = 11 : i64} {
  func.func @_rnn_lltm_kernel(%arg0: memref<8x1024xf32, #tpu.memory_space<vmem>>, %arg1: memref<1024x384xf32, #tpu.memory_space<vmem>>, %arg2: memref<1x384xf32, #tpu.memory_space<vmem>>, %arg3: memref<8x128xf32, #tpu.memory_space<vmem>>, %arg4: memref<128x128xf32, #tpu.memory_space<vmem>>, %arg5: memref<1x128xf32, #tpu.memory_space<vmem>>, %arg6: memref<8x128xf32, #tpu.memory_space<vmem>>) attributes {dimension_semantics = [], scalar_prefetch = 0 : i64, scratch_operands = 0 : i64, tpu.core_type = #tpu.core_type<tc>} {
    %c0 = arith.constant 0 : index
    %c0_0 = arith.constant 0 : index
    %0 = vector.load %arg0[%c0, %c0_0] : memref<8x1024xf32, #tpu.memory_space<vmem>>, vector<8x1024xf32>
    %c0_1 = arith.constant 0 : index
    %c0_2 = arith.constant 0 : index
    %1 = vector.load %arg1[%c0_1, %c0_2] : memref<1024x384xf32, #tpu.memory_space<vmem>>, vector<1024x384xf32>
    %cst = arith.constant dense<0.000000e+00> : vector<8x384xf32>
    %2 = tpu.matmul %0, %1, %cst {dimension_numbers = #tpu.dot_dimension_numbers<[1], [0], [0], [1], [0, 0, 1, 1], [], []>} : vector<8x1024xf32>, vector<1024x384xf32>, vector<8x384xf32> -> vector<8x384xf32>
    %c0_3 = arith.constant 0 : index
    %c0_4 = arith.constant 0 : index
    %3 = vector.load %arg2[%c0_3, %c0_4] : memref<1x384xf32, #tpu.memory_space<vmem>>, vector<1x384xf32>
    %4 = vector.broadcast %3 : vector<1x384xf32> to vector<8x384xf32>
    %5 = arith.addf %2, %4 : vector<8x384xf32>
    %6 = vector.extract_strided_slice %5 {offsets = [0, 0], sizes = [8, 128], strides = [1, 1]} : vector<8x384xf32> to vector<8x128xf32>
    %7 = vector.extract_strided_slice %5 {offsets = [0, 128], sizes = [8, 128], strides = [1, 1]} : vector<8x384xf32> to vector<8x128xf32>
    %8 = vector.extract_strided_slice %5 {offsets = [0, 256], sizes = [8, 128], strides = [1, 1]} : vector<8x384xf32> to vector<8x128xf32>
    %9 = arith.negf %6 : vector<8x128xf32>
    %10 = math.exp %9 : vector<8x128xf32>
    %cst_5 = arith.constant 1.000000e+00 : f32
    %11 = vector.broadcast %cst_5 : f32 to vector<8x128xf32>
    %12 = arith.addf %11, %10 : vector<8x128xf32>
    %13 = arith.divf %11, %12 : vector<8x128xf32>
    %14 = arith.negf %7 : vector<8x128xf32>
    %15 = math.exp %14 : vector<8x128xf32>
    %cst_6 = arith.constant 1.000000e+00 : f32
    %16 = vector.broadcast %cst_6 : f32 to vector<8x128xf32>
    %17 = arith.addf %16, %15 : vector<8x128xf32>
    %18 = arith.divf %16, %17 : vector<8x128xf32>
    %cst_7 = arith.constant 0.000000e+00 : f32
    %19 = vector.broadcast %cst_7 : f32 to vector<8x128xf32>
    %20 = arith.cmpf ogt, %8, %19 : vector<8x128xf32>
    %21 = math.exp %8 : vector<8x128xf32>
    %cst_8 = arith.constant 1.000000e+00 : f32
    %22 = vector.broadcast %cst_8 : f32 to vector<8x128xf32>
    %23 = arith.subf %21, %22 : vector<8x128xf32>
    %24 = arith.select %20, %8, %23 : vector<8x128xi1>, vector<8x128xf32>
    %c0_9 = arith.constant 0 : index
    %c0_10 = arith.constant 0 : index
    %25 = vector.load %arg3[%c0_9, %c0_10] : memref<8x128xf32, #tpu.memory_space<vmem>>, vector<8x128xf32>
    %26 = arith.mulf %24, %13 : vector<8x128xf32>
    %27 = arith.addf %25, %26 : vector<8x128xf32>
    %28 = math.tanh %27 : vector<8x128xf32>
    %29 = arith.mulf %28, %18 : vector<8x128xf32>
    %c0_11 = arith.constant 0 : index
    %c0_12 = arith.constant 0 : index
    %30 = vector.load %arg4[%c0_11, %c0_12] : memref<128x128xf32, #tpu.memory_space<vmem>>, vector<128x128xf32>
    %cst_13 = arith.constant dense<0.000000e+00> : vector<8x128xf32>
    %31 = tpu.matmul %29, %30, %cst_13 {dimension_numbers = #tpu.dot_dimension_numbers<[1], [0], [0], [1], [0, 0, 1, 1], [], []>} : vector<8x128xf32>, vector<128x128xf32>, vector<8x128xf32> -> vector<8x128xf32>
    %c0_14 = arith.constant 0 : index
    %c0_15 = arith.constant 0 : index
    %32 = vector.load %arg5[%c0_14, %c0_15] : memref<1x128xf32, #tpu.memory_space<vmem>>, vector<1x128xf32>
    %33 = vector.broadcast %32 : vector<1x128xf32> to vector<8x128xf32>
    %34 = arith.addf %31, %33 : vector<8x128xf32>
    %c0_16 = arith.constant 0 : index
    %c0_17 = arith.constant 0 : index
    %35 = vector.load %arg6[%c0_16, %c0_17] : memref<8x128xf32, #tpu.memory_space<vmem>>, vector<8x128xf32>
    tpu.vector_store %arg6[%c0_16, %c0_17], %34 {strides = array<i32>} : memref<8x128xf32, #tpu.memory_space<vmem>>, vector<8x128xf32>,
    return
  }
}

</mosaic_0001>

<bundles_post_ra>
// kernel: rnn_lltm_forward.1
= control target key start
LH: loop header
LB: loop body
LE: loop exit
PB: predicated region body
PF: predicated region fallthrough
CT: control target
= control target key end

     0   :  { %vm1744_vm0 = vmmov 0   ;;  %s3051_s1 = inlined_call_operand.vmem [shape: f32[1024,384], index: 1, kind: input, shape index: {}]   ;;  %s3052_s0 = inlined_call_operand.vmem [shape: f32[8,1024], index: 0, kind: input, shape index: {}]   ;;  %s3053_s4 = inlined_call_operand.vmem [shape: f32[128,128], index: 4, kind: input, shape index: {}]   ;;  %s3054_s2 = inlined_call_operand.vmem [shape: f32[1,384], index: 2, kind: input, shape index: {}]   ;;  %s3055_s3 = inlined_call_operand.vmem [shape: f32[8,128], index: 3, kind: input, shape index: {}]   ;;  %s3056_s5 = inlined_call_operand.vmem [shape: f32[1,128], index: 5, kind: input, shape index: {}]   ;;  %s3057_s6 = inlined_call_operand.vmem [shape: f32[8,128], index: 6, kind: output, shape index: {}]  }
   0x1   :  { %v32_v0 = vld [vmem:[%s3051_s1 + $0x8] sm:$0xff]  ;;  %v35_v1 = vld [vmem:[%s3051_s1 + $0x20] sm:$0xff]  ;;  %v34_v6 = vld [vmem:[%s3051_s1 + $0x18] sm:$0xff] }
   0x2   :  { %v128_v2 = vld [vmem:[%s3051_s1 + $0x308] sm:$0xff]  ;;  %v1312_v3 = vpack.c.bf16 %v35_v1, %v32_v0  ;;  %v131_v4 = vld [vmem:[%s3051_s1 + $0x320] sm:$0xff]  ;;  %v130_v10 = vld [vmem:[%s3051_s1 + $0x318] sm:$0xff] }
   0x3   :  { %v31_v5 = vld [vmem:[%s3051_s1] sm:$0xff]  ;;  %v1376_v7 = vpack.c.bf16 %v131_v4, %v128_v2  ;;  %v38_v11 = vld [vmem:[%s3051_s1 + $0x38] sm:$0xff]  ;;  %v41_v13 = vld [vmem:[%s3051_s1 + $0x50] sm:$0xff] }
   0x4   :  { %v1314_v8 = vpack.c.bf16 %v34_v6, %v31_v5  ;;  %v127_v9 = vld [vmem:[%s3051_s1 + $0x300] sm:$0xff]  ;;  %1313 = vmatprep.subr.bf16.mxu1 %v1312_v3  ;;  %v134_v14 = vld [vmem:[%s3051_s1 + $0x338] sm:$0xff]  ;;  %v137_v15 = vld [vmem:[%s3051_s1 + $0x350] sm:$0xff]  ;;  %v1316_v16 = vpack.c.bf16 %v41_v13, %v38_v11 }
   0x5   :  { %v1378_v12 = vpack.c.bf16 %v130_v10, %v127_v9  ;;  %1377 = vmatprep.subr.bf16.mxu0 %v1376_v7  ;;  %v1380_v17 = vpack.c.bf16 %v137_v15, %v134_v14  ;;  %v37_v18 = vld [vmem:[%s3051_s1 + $0x30] sm:$0xff]  ;;  %v40_v19 = vld [vmem:[%s3051_s1 + $0x48] sm:$0xff]  ;;  %v47_v24 = vld [vmem:[%s3051_s1 + $0x80] sm:$0xff] }
   0x6   :  { %1315 = vmatpush1.bf16.msra.mxu1 %v1314_v8  ;;  %v133_v20 = vld [vmem:[%s3051_s1 + $0x330] sm:$0xff]  ;;  %v1318_v21 = vpack.c.bf16 %v40_v19, %v37_v18  ;;  %v136_v22 = vld [vmem:[%s3051_s1 + $0x348] sm:$0xff]  ;;  %v143_v28 = vld [vmem:[%s3051_s1 + $0x380] sm:$0xff] }
   0x7   :  { %1379 = vmatpush1.bf16.msra.mxu0 %v1378_v12  ;;  %v44_v23 = vld [vmem:[%s3051_s1 + $0x68] sm:$0xff]  ;;  %1317 = vmatprep.subr.bf16.mxu1 %v1316_v16  ;;  %v1382_v25 = vpack.c.bf16 %v136_v22, %v133_v20  ;;  %v43_v29 = vld [vmem:[%s3051_s1 + $0x60] sm:$0xff]  ;;  %v46_v31 = vld [vmem:[%s3051_s1 + $0x78] sm:$0xff] }
   0x8   :  { %1381 = vmatprep.subr.bf16.mxu0 %v1380_v17  ;;  %v1320_v26 = vpack.c.bf16 %v47_v24, %v44_v23  ;;  %v140_v27 = vld [vmem:[%s3051_s1 + $0x368] sm:$0xff]  ;;  %v139_v32 = vld [vmem:[%s3051_s1 + $0x360] sm:$0xff]  ;;  %v142_v33 = vld [vmem:[%s3051_s1 + $0x378] sm:$0xff]  ;;  %v1322_v34 = vpack.c.bf16 %v46_v31, %v43_v29 }
   0x9   :  { %v1384_v30 = vpack.c.bf16 %v143_v28, %v140_v27  ;;  %v50_v35 = vld [vmem:[%s3051_s1 + $0x98] sm:$0xff]  ;;  %v53_v36 = vld [vmem:[%s3051_s1 + $0xb0] sm:$0xff]  ;;  %v1386_v38 = vpack.c.bf16 %v142_v33, %v139_v32  ;;  %v52_v42 = vld [vmem:[%s3051_s1 + $0xa8] sm:$0xff] }
   0xa   :  { %1319 = vmatpush1.bf16.msra.mxu1 %v1318_v21  ;;  %v146_v37 = vld [vmem:[%s3051_s1 + $0x398] sm:$0xff]  ;;  %v1324_v39 = vpack.c.bf16 %v53_v36, %v50_v35  ;;  %v149_v40 = vld [vmem:[%s3051_s1 + $0x3b0] sm:$0xff]  ;;  %v148_v45 = vld [vmem:[%s3051_s1 + $0x3a8] sm:$0xff] }
   0xb   :  { %1383 = vmatpush1.bf16.msra.mxu0 %v1382_v25  ;;  %1321 = vmatprep.subr.bf16.mxu1 %v1320_v26  ;;  %v49_v41 = vld [vmem:[%s3051_s1 + $0x90] sm:$0xff]  ;;  %v1388_v43 = vpack.c.bf16 %v149_v40, %v146_v37  ;;  %v56_v46 = vld [vmem:[%s3051_s1 + $0xc8] sm:$0xff]  ;;  %v59_v47 = vld [vmem:[%s3051_s1 + $0xe0] sm:$0xff] }
   0xc   :  { %1385 = vmatprep.subr.bf16.mxu0 %v1384_v30  ;;  %v145_v44 = vld [vmem:[%s3051_s1 + $0x390] sm:$0xff]  ;;  %v152_v48 = vld [vmem:[%s3051_s1 + $0x3c8] sm:$0xff]  ;;  %v155_v49 = vld [vmem:[%s3051_s1 + $0x3e0] sm:$0xff]  ;;  %v1326_v50 = vpack.c.bf16 %v52_v42, %v49_v41  ;;  %v1328_v52 = vpack.c.bf16 %v59_v47, %v56_v46 }
   0xd   :  { %v1390_v51 = vpack.c.bf16 %v148_v45, %v145_v44  ;;  %v55_v53 = vld [vmem:[%s3051_s1 + $0xc0] sm:$0xff]  ;;  %v58_v54 = vld [vmem:[%s3051_s1 + $0xd8] sm:$0xff]  ;;  %v1392_v56 = vpack.c.bf16 %v155_v49, %v152_v48  ;;  %v65_v59 = vld [vmem:[%s3051_s1 + $0x110] sm:$0xff] }
   0xe   :  { %1323 = vmatpush1.bf16.msra.mxu1 %v1322_v34  ;;  %v151_v55 = vld [vmem:[%s3051_s1 + $0x3c0] sm:$0xff]  ;;  %v154_v57 = vld [vmem:[%s3051_s1 + $0x3d8] sm:$0xff]  ;;  %v161_v61 = vld [vmem:[%s3051_s1 + $0x410] sm:$0xff]  ;;  %v1330_v62 = vpack.c.bf16 %v58_v54, %v55_v53 }
   0xf   :  { %1387 = vmatpush1.bf16.msra.mxu0 %v1386_v38  ;;  %1325 = vmatprep.subr.bf16.mxu1 %v1324_v39  ;;  %v62_v58 = vld [vmem:[%s3051_s1 + $0xf8] sm:$0xff]  ;;  %v1394_v63 = vpack.c.bf16 %v154_v57, %v151_v55  ;;  %v61_v1 = vld [vmem:[%s3051_s1 + $0xf0] sm:$0xff]  ;;  %v64_v2 = vld [vmem:[%s3051_s1 + $0x108] sm:$0xff] }
  0x10   :  { %1389 = vmatprep.subr.bf16.mxu0 %v1388_v43  ;;  %v158_v60 = vld [vmem:[%s3051_s1 + $0x3f8] sm:$0xff]  ;;  %v1332_v0 = vpack.c.bf16 %v65_v59, %v62_v58  ;;  %v157_v3 = vld [vmem:[%s3051_s1 + $0x3f0] sm:$0xff]  ;;  %v160_v5 = vld [vmem:[%s3051_s1 + $0x408] sm:$0xff]  ;;  %v1334_v10 = vpack.c.bf16 %v64_v2, %v61_v1 }
  0x11   :  { %v1396_v4 = vpack.c.bf16 %v161_v61, %v158_v60  ;;  %v68_v6 = vld [vmem:[%s3051_s1 + $0x128] sm:$0xff]  ;;  %v71_v7 = vld [vmem:[%s3051_s1 + $0x140] sm:$0xff]  ;;  %v1398_v11 = vpack.c.bf16 %v160_v5, %v157_v3  ;;  %v70_v14 = vld [vmem:[%s3051_s1 + $0x138] sm:$0xff] }
  0x12   :  { %1327 = vmatpush1.bf16.msra.mxu1 %v1326_v50  ;;  %v164_v8 = vld [vmem:[%s3051_s1 + $0x428] sm:$0xff]  ;;  %v167_v9 = vld [vmem:[%s3051_s1 + $0x440] sm:$0xff]  ;;  %v1336_v12 = vpack.c.bf16 %v71_v7, %v68_v6  ;;  %v166_v17 = vld [vmem:[%s3051_s1 + $0x438] sm:$0xff] }
  0x13   :  { %1391 = vmatpush1.bf16.msra.mxu0 %v1390_v51  ;;  %1329 = vmatprep.subr.bf16.mxu1 %v1328_v52  ;;  %v67_v13 = vld [vmem:[%s3051_s1 + $0x120] sm:$0xff]  ;;  %v1400_v16 = vpack.c.bf16 %v167_v9, %v164_v8  ;;  %v74_v18 = vld [vmem:[%s3051_s1 + $0x158] sm:$0xff]  ;;  %v77_v19 = vld [vmem:[%s3051_s1 + $0x170] sm:$0xff] }
  0x14   :  { %1393 = vmatprep.subr.bf16.mxu0 %v1392_v56  ;;  %v163_v15 = vld [vmem:[%s3051_s1 + $0x420] sm:$0xff]  ;;  %v170_v20 = vld [vmem:[%s3051_s1 + $0x458] sm:$0xff]  ;;  %v173_v21 = vld [vmem:[%s3051_s1 + $0x470] sm:$0xff]  ;;  %v1338_v22 = vpack.c.bf16 %v70_v14, %v67_v13  ;;  %v1340_v24 = vpack.c.bf16 %v77_v19, %v74_v18 }
  0x15   :  { %v1402_v23 = vpack.c.bf16 %v166_v17, %v163_v15  ;;  %v73_v25 = vld [vmem:[%s3051_s1 + $0x150] sm:$0xff]  ;;  %v76_v26 = vld [vmem:[%s3051_s1 + $0x168] sm:$0xff]  ;;  %v1404_v28 = vpack.c.bf16 %v173_v21, %v170_v20  ;;  %v83_v31 = vld [vmem:[%s3051_s1 + $0x1a0] sm:$0xff] }
  0x16   :  { %1331 = vmatpush1.bf16.msra.mxu1 %v1330_v62  ;;  %v169_v27 = vld [vmem:[%s3051_s1 + $0x450] sm:$0xff]  ;;  %v172_v29 = vld [vmem:[%s3051_s1 + $0x468] sm:$0xff]  ;;  %v179_v33 = vld [vmem:[%s3051_s1 + $0x4a0] sm:$0xff]  ;;  %v1342_v34 = vpack.c.bf16 %v76_v26, %v73_v25 }
  0x17   :  { %1395 = vmatpush1.bf16.msra.mxu0 %v1394_v63  ;;  %1333 = vmatprep.subr.bf16.mxu1 %v1332_v0  ;;  %v80_v30 = vld [vmem:[%s3051_s1 + $0x188] sm:$0xff]  ;;  %v1406_v35 = vpack.c.bf16 %v172_v29, %v169_v27  ;;  %v79_v37 = vld [vmem:[%s3051_s1 + $0x180] sm:$0xff]  ;;  %v82_v38 = vld [vmem:[%s3051_s1 + $0x198] sm:$0xff] }
  0x18   :  { %1397 = vmatprep.subr.bf16.mxu0 %v1396_v4  ;;  %v176_v32 = vld [vmem:[%s3051_s1 + $0x488] sm:$0xff]  ;;  %v1344_v36 = vpack.c.bf16 %v83_v31, %v80_v30  ;;  %v175_v39 = vld [vmem:[%s3051_s1 + $0x480] sm:$0xff]  ;;  %v178_v41 = vld [vmem:[%s3051_s1 + $0x498] sm:$0xff]  ;;  %v1346_v46 = vpack.c.bf16 %v82_v38, %v79_v37 }
  0x19   :  { %v1408_v40 = vpack.c.bf16 %v179_v33, %v176_v32  ;;  %v86_v42 = vld [vmem:[%s3051_s1 + $0x1b8] sm:$0xff]  ;;  %v89_v43 = vld [vmem:[%s3051_s1 + $0x1d0] sm:$0xff]  ;;  %v1410_v47 = vpack.c.bf16 %v178_v41, %v175_v39  ;;  %v88_v50 = vld [vmem:[%s3051_s1 + $0x1c8] sm:$0xff] }
  0x1a   :  { %1335 = vmatpush1.bf16.msra.mxu1 %v1334_v10  ;;  %v182_v44 = vld [vmem:[%s3051_s1 + $0x4b8] sm:$0xff]  ;;  %v185_v45 = vld [vmem:[%s3051_s1 + $0x4d0] sm:$0xff]  ;;  %v1348_v48 = vpack.c.bf16 %v89_v43, %v86_v42  ;;  %v184_v53 = vld [vmem:[%s3051_s1 + $0x4c8] sm:$0xff] }
  0x1b   :  { %1399 = vmatpush1.bf16.msra.mxu0 %v1398_v11  ;;  %1337 = vmatprep.subr.bf16.mxu1 %v1336_v12  ;;  %v85_v49 = vld [vmem:[%s3051_s1 + $0x1b0] sm:$0xff]  ;;  %v1412_v52 = vpack.c.bf16 %v185_v45, %v182_v44  ;;  %v92_v54 = vld [vmem:[%s3051_s1 + $0x1e8] sm:$0xff]  ;;  %v95_v55 = vld [vmem:[%s3051_s1 + $0x200] sm:$0xff] }
  0x1c   :  { %1401 = vmatprep.subr.bf16.mxu0 %v1400_v16  ;;  %v181_v51 = vld [vmem:[%s3051_s1 + $0x4b0] sm:$0xff]  ;;  %v188_v56 = vld [vmem:[%s3051_s1 + $0x4e8] sm:$0xff]  ;;  %v191_v57 = vld [vmem:[%s3051_s1 + $0x500] sm:$0xff]  ;;  %v1350_v58 = vpack.c.bf16 %v88_v50, %v85_v49  ;;  %v1352_v60 = vpack.c.bf16 %v95_v55, %v92_v54 }
  0x1d   :  { %v1414_v59 = vpack.c.bf16 %v184_v53, %v181_v51  ;;  %v91_v61 = vld [vmem:[%s3051_s1 + $0x1e0] sm:$0xff]  ;;  %v94_v62 = vld [vmem:[%s3051_s1 + $0x1f8] sm:$0xff]  ;;  %v1416_v0 = vpack.c.bf16 %v191_v57, %v188_v56  ;;  %v101_v3 = vld [vmem:[%s3051_s1 + $0x230] sm:$0xff] }
  0x1e   :  { %1339 = vmatpush1.bf16.msra.mxu1 %v1338_v22  ;;  %v187_v63 = vld [vmem:[%s3051_s1 + $0x4e0] sm:$0xff]  ;;  %v190_v1 = vld [vmem:[%s3051_s1 + $0x4f8] sm:$0xff]  ;;  %v197_v5 = vld [vmem:[%s3051_s1 + $0x530] sm:$0xff]  ;;  %v1354_v6 = vpack.c.bf16 %v94_v62, %v91_v61 }
  0x1f   :  { %1403 = vmatpush1.bf16.msra.mxu0 %v1402_v23  ;;  %1341 = vmatprep.subr.bf16.mxu1 %v1340_v24  ;;  %v98_v2 = vld [vmem:[%s3051_s1 + $0x218] sm:$0xff]  ;;  %v97_v7 = vld [vmem:[%s3051_s1 + $0x210] sm:$0xff]  ;;  %v1418_v8 = vpack.c.bf16 %v190_v1, %v187_v63  ;;  %v100_v10 = vld [vmem:[%s3051_s1 + $0x228] sm:$0xff] }
  0x20   :  { %1405 = vmatprep.subr.bf16.mxu0 %v1404_v28  ;;  %v194_v4 = vld [vmem:[%s3051_s1 + $0x518] sm:$0xff]  ;;  %v1356_v9 = vpack.c.bf16 %v101_v3, %v98_v2  ;;  %v193_v11 = vld [vmem:[%s3051_s1 + $0x510] sm:$0xff]  ;;  %v196_v12 = vld [vmem:[%s3051_s1 + $0x528] sm:$0xff]  ;;  %v1358_v20 = vpack.c.bf16 %v100_v10, %v97_v7 }
  0x21   :  { %v1420_v13 = vpack.c.bf16 %v197_v5, %v194_v4  ;;  %v104_v14 = vld [vmem:[%s3051_s1 + $0x248] sm:$0xff]  ;;  %v107_v15 = vld [vmem:[%s3051_s1 + $0x260] sm:$0xff]  ;;  %v2090_v19 = vld [vmem:[%s3052_s0 + $0x18] sm:$0xff]  ;;  %v1422_v21 = vpack.c.bf16 %v196_v12, %v193_v11 }
  0x22   :  { %1343 = vmatpush1.bf16.msra.mxu1 %v1342_v34  ;;  %v2078_v16 = vld [vmem:[%s3052_s0 + $0x8] sm:$0xff]  ;;  %v203_v18 = vld [vmem:[%s3051_s1 + $0x560] sm:$0xff]  ;;  %567 = vmatprep.mubr.f32.mxu0 %v2090_v19  ;;  %v1360_v22 = vpack.c.bf16 %v107_v15, %v104_v14  ;;  %v106_v24 = vld [vmem:[%s3051_s1 + $0x258] sm:$0xff] }
  0x23   :  { %1407 = vmatpush1.bf16.msra.mxu0 %v1406_v35  ;;  %1345 = vmatprep.subr.bf16.mxu1 %v1344_v36  ;;  %v200_v17 = vld [vmem:[%s3051_s1 + $0x548] sm:$0xff]  ;;  %v103_v23 = vld [vmem:[%s3051_s1 + $0x240] sm:$0xff]  ;;  %v202_v27 = vld [vmem:[%s3051_s1 + $0x558] sm:$0xff] }
  0x24   :  { %1409 = vmatprep.subr.bf16.mxu0 %v1408_v40  ;;  %496 = vmatprep.mubr.f32.mxu1 %v2078_v16  ;;  %v199_v25 = vld [vmem:[%s3051_s1 + $0x540] sm:$0xff]  ;;  %v1424_v26 = vpack.c.bf16 %v203_v18, %v200_v17  ;;  %v110_v28 = vld [vmem:[%s3051_s1 + $0x278] sm:$0xff]  ;;  %v113_v29 = vld [vmem:[%s3051_s1 + $0x290] sm:$0xff]  ;;  %v1362_v32 = vpack.c.bf16 %v106_v24, %v103_v23 }
  0x25   :  { %v206_v30 = vld [vmem:[%s3051_s1 + $0x578] sm:$0xff]  ;;  %v209_v31 = vld [vmem:[%s3051_s1 + $0x590] sm:$0xff]  ;;  %v1426_v33 = vpack.c.bf16 %v202_v27, %v199_v25  ;;  %v1364_v34 = vpack.c.bf16 %v113_v29, %v110_v28  ;;  %v112_v36 = vld [vmem:[%s3051_s1 + $0x288] sm:$0xff] }
  0x26   :  { %1347 = vmatpush1.bf16.msra.mxu1 %v1346_v46  ;;  %v109_v35 = vld [vmem:[%s3051_s1 + $0x270] sm:$0xff]  ;;  %v1428_v38 = vpack.c.bf16 %v209_v31, %v206_v30  ;;  %v208_v39 = vld [vmem:[%s3051_s1 + $0x588] sm:$0xff]  ;;  %v119_v41 = vld [vmem:[%s3051_s1 + $0x2c0] sm:$0xff] }
  0x27   :  { %1411 = vmatpush1.bf16.msra.mxu0 %v1410_v47  ;;  %1349 = vmatprep.subr.bf16.mxu1 %v1348_v48  ;;  %v205_v37 = vld [vmem:[%s3051_s1 + $0x570] sm:$0xff]  ;;  %v116_v40 = vld [vmem:[%s3051_s1 + $0x2a8] sm:$0xff]  ;;  %v215_v43 = vld [vmem:[%s3051_s1 + $0x5c0] sm:$0xff]  ;;  %v1366_v44 = vpack.c.bf16 %v112_v36, %v109_v35 }
  0x28   :  { %1413 = vmatprep.subr.bf16.mxu0 %v1412_v52  ;;  %v212_v42 = vld [vmem:[%s3051_s1 + $0x5a8] sm:$0xff]  ;;  %v1430_v45 = vpack.c.bf16 %v208_v39, %v205_v37  ;;  %v1368_v46 = vpack.c.bf16 %v119_v41, %v116_v40  ;;  %v115_v47 = vld [vmem:[%s3051_s1 + $0x2a0] sm:$0xff]  ;;  %v118_v48 = vld [vmem:[%s3051_s1 + $0x2b8] sm:$0xff] }
  0x29   :  { %v211_v49 = vld [vmem:[%s3051_s1 + $0x5a0] sm:$0xff]  ;;  %v1432_v50 = vpack.c.bf16 %v215_v43, %v212_v42  ;;  %v214_v51 = vld [vmem:[%s3051_s1 + $0x5b8] sm:$0xff]  ;;  %v125_v53 = vld [vmem:[%s3051_s1 + $0x2f0] sm:$0xff]  ;;  %v1370_v56 = vpack.c.bf16 %v118_v48, %v115_v47 }
  0x2a   :  { %1351 = vmatpush1.bf16.msra.mxu1 %v1350_v58  ;;  %v122_v52 = vld [vmem:[%s3051_s1 + $0x2d8] sm:$0xff]  ;;  %v221_v55 = vld [vmem:[%s3051_s1 + $0x5f0] sm:$0xff]  ;;  %v1434_v57 = vpack.c.bf16 %v214_v51, %v211_v49  ;;  %v220_v63 = vld [vmem:[%s3051_s1 + $0x5e8] sm:$0xff] }
  0x2b   :  { %1415 = vmatpush1.bf16.msra.mxu0 %v1414_v59  ;;  %1353 = vmatprep.subr.bf16.mxu1 %v1352_v60  ;;  %v218_v54 = vld [vmem:[%s3051_s1 + $0x5d8] sm:$0xff]  ;;  %v1372_v58 = vpack.c.bf16 %v125_v53, %v122_v52  ;;  %v121_v59 = vld [vmem:[%s3051_s1 + $0x2d0] sm:$0xff]  ;;  %v124_v60 = vld [vmem:[%s3051_s1 + $0x2e8] sm:$0xff] }
  0x2c   :  { %1417 = vmatprep.subr.bf16.mxu0 %v1416_v0  ;;  %v217_v61 = vld [vmem:[%s3051_s1 + $0x5d0] sm:$0xff]  ;;  %v1436_v62 = vpack.c.bf16 %v221_v55, %v218_v54  ;;  %v84_v1 = vld [vmem:[%s3051_s1 + $0x1a8] sm:$0xff]  ;;  %v227_v3 = vld [vmem:[%s3051_s1 + $0x620] sm:$0xff]  ;;  %v1374_v4 = vpack.c.bf16 %v124_v60, %v121_v59 }
  0x2d   :  { %v81_v0 = vld [vmem:[%s3051_s1 + $0x190] sm:$0xff]  ;;  %v224_v2 = vld [vmem:[%s3051_s1 + $0x608] sm:$0xff]  ;;  %v1438_v5 = vpack.c.bf16 %v220_v63, %v217_v61  ;;  %v223_v7 = vld [vmem:[%s3051_s1 + $0x600] sm:$0xff] }
  0x2e   :  { %1355 = vmatpush1.bf16.msra.mxu1 %v1354_v6  ;;  %v1568_v6 = vpack.c.bf16 %v84_v1, %v81_v0  ;;  %v1440_v10 = vpack.c.bf16 %v227_v3, %v224_v2  ;;  %v226_v11 = vld [vmem:[%s3051_s1 + $0x618] sm:$0xff]  ;;  %v87_v12 = vld [vmem:[%s3051_s1 + $0x1c0] sm:$0xff]  ;;  %v233_v15 = vld [vmem:[%s3051_s1 + $0x650] sm:$0xff] }
  0x2f   :  { %1419 = vmatpush1.bf16.msra.mxu0 %v1418_v8  ;;  %1357 = vmatprep.subr.bf16.mxu1 %v1356_v9  ;;  %v33_v8 = vld [vmem:[%s3051_s1 + $0x10] sm:$0xff]  ;;  %v36_v9 = vld [vmem:[%s3051_s1 + $0x28] sm:$0xff]  ;;  %v230_v14 = vld [vmem:[%s3051_s1 + $0x638] sm:$0xff] }
  0x30   :  { %1421 = vmatprep.subr.bf16.mxu0 %v1420_v13  ;;  %v90_v13 = vld [vmem:[%s3051_s1 + $0x1d8] sm:$0xff]  ;;  %v2216_v17 = vld [vmem:[%s3052_s0] sm:$0xff]  ;;  %v2221_v18 = vld [vmem:[%s3052_s0 + $0x10] sm:$0xff] }
  0x31   :  { %v229_v23 = vld [vmem:[%s3051_s1 + $0x630] sm:$0xff]  ;;  %v39_v24 = vld [vmem:[%s3051_s1 + $0x40] sm:$0xff]  ;;  %v42_v25 = vld [vmem:[%s3051_s1 + $0x58] sm:$0xff] }
  0x32   :  { %1359 = vmatpush1.bf16.msra.mxu1 %v1358_v20  ;;  %v1570_v20 = vpack.c.bf16 %v36_v9, %v33_v8  ;;  %v232_v27 = vld [vmem:[%s3051_s1 + $0x648] sm:$0xff]  ;;  %v93_v28 = vld [vmem:[%s3051_s1 + $0x1f0] sm:$0xff]  ;;  %v239_v31 = vld [vmem:[%s3051_s1 + $0x680] sm:$0xff] }
  0x33   :  { %1423 = vmatpush1.bf16.msra.mxu0 %v1422_v21  ;;  %1361 = vmatprep.subr.bf16.mxu1 %v1360_v22  ;;  %v1442_v21 = vpack.c.bf16 %v226_v11, %v223_v7  ;;  %v1572_v22 = vpack.c.bf16 %v90_v13, %v87_v12  ;;  %v96_v29 = vld [vmem:[%s3051_s1 + $0x208] sm:$0xff]  ;;  %v235_v35 = vld [vmem:[%s3051_s1 + $0x660] sm:$0xff]  ;;  %v45_v36 = vld [vmem:[%s3051_s1 + $0x70] sm:$0xff] }
  0x34   :  { %1425 = vmatprep.subr.bf16.mxu0 %v1424_v26  ;;  %v1444_v26 = vpack.c.bf16 %v233_v15, %v230_v14  ;;  %v236_v30 = vld [vmem:[%s3051_s1 + $0x668] sm:$0xff]  ;;  %v238_v39 = vld [vmem:[%s3051_s1 + $0x678] sm:$0xff]  ;;  %v99_v40 = vld [vmem:[%s3051_s1 + $0x220] sm:$0xff] }
  0x35   :  { %v48_v37 = vld [vmem:[%s3051_s1 + $0x88] sm:$0xff]  ;;  %v102_v41 = vld [vmem:[%s3051_s1 + $0x238] sm:$0xff]  ;;  %v245_v43 = vld [vmem:[%s3051_s1 + $0x6b0] sm:$0xff] }
  0x36   :  { %1363 = vmatpush1.bf16.msra.mxu1 %v1362_v32  ;;  %v1574_v32 = vpack.c.bf16 %v42_v25, %v39_v24  ;;  %v242_v42 = vld [vmem:[%s3051_s1 + $0x698] sm:$0xff]  ;;  %v241_v47 = vld [vmem:[%s3051_s1 + $0x690] sm:$0xff]  ;;  %v108_v52 = vld [vmem:[%s3051_s1 + $0x268] sm:$0xff] }
  0x37   :  { %1427 = vmatpush1.bf16.msra.mxu0 %v1426_v33  ;;  %1365 = vmatprep.subr.bf16.mxu1 %v1364_v34  ;;  %v1446_v33 = vpack.c.bf16 %v232_v27, %v229_v23  ;;  %v1576_v34 = vpack.c.bf16 %v96_v29, %v93_v28  ;;  %v54_v48 = vld [vmem:[%s3051_s1 + $0xb8] sm:$0xff]  ;;  %v1452_v49 = vpack.c.bf16 %v245_v43, %v242_v42  ;;  %v105_v51 = vld [vmem:[%s3051_s1 + $0x250] sm:$0xff]  ;;  %v248_v53 = vld [vmem:[%s3051_s1 + $0x6c8] sm:$0xff] }
  0x38   :  { %1429 = vmatprep.subr.bf16.mxu0 %v1428_v38  ;;  %v1448_v38 = vpack.c.bf16 %v239_v31, %v236_v30  ;;  %v251_v54 = vld [vmem:[%s3051_s1 + $0x6e0] sm:$0xff]  ;;  %v57_v59 = vld [vmem:[%s3051_s1 + $0xd0] sm:$0xff]  ;;  %v60_v60 = vld [vmem:[%s3051_s1 + $0xe8] sm:$0xff] }
  0x39   :  { %v1456_v61 = vpack.c.bf16 %v251_v54, %v248_v53  ;;  %v111_v63 = vld [vmem:[%s3051_s1 + $0x280] sm:$0xff]  ;;  %v114_v0 = vld [vmem:[%s3051_s1 + $0x298] sm:$0xff]  ;;  %v257_v2 = vld [vmem:[%s3051_s1 + $0x710] sm:$0xff]  ;;  %v1586_v3 = vpack.c.bf16 %v60_v60, %v57_v59 }
  0x3a   :  { %1367 = vmatpush1.bf16.msra.mxu1 %v1366_v44  ;;  %v1578_v44 = vpack.c.bf16 %v48_v37, %v45_v36  ;;  %v254_v1 = vld [vmem:[%s3051_s1 + $0x6f8] sm:$0xff]  ;;  %v63_v7 = vld [vmem:[%s3051_s1 + $0x100] sm:$0xff]  ;;  %v117_v11 = vld [vmem:[%s3051_s1 + $0x2b0] sm:$0xff] }
  0x3b   :  { %1431 = vmatpush1.bf16.msra.mxu0 %v1430_v45  ;;  %1369 = vmatprep.subr.bf16.mxu1 %v1368_v46  ;;  %v1450_v45 = vpack.c.bf16 %v238_v39, %v235_v35  ;;  %v1580_v46 = vpack.c.bf16 %v102_v41, %v99_v40  ;;  %v66_v8 = vld [vmem:[%s3051_s1 + $0x118] sm:$0xff]  ;;  %v1460_v9 = vpack.c.bf16 %v257_v2, %v254_v1  ;;  %v120_v12 = vld [vmem:[%s3051_s1 + $0x2c8] sm:$0xff]  ;;  %v263_v14 = vld [vmem:[%s3051_s1 + $0x740] sm:$0xff] }
  0x3c   :  { %1433 = vmatprep.subr.bf16.mxu0 %v1432_v50  ;;  %v244_v50 = vld [vmem:[%s3051_s1 + $0x6a8] sm:$0xff]  ;;  %v1590_v15 = vpack.c.bf16 %v66_v8, %v63_v7  ;;  %v262_v23 = vld [vmem:[%s3051_s1 + $0x738] sm:$0xff]  ;;  %v69_v24 = vld [vmem:[%s3051_s1 + $0x130] sm:$0xff] }
  0x3d   :  { %v260_v13 = vld [vmem:[%s3051_s1 + $0x728] sm:$0xff]  ;;  %v123_v27 = vld [vmem:[%s3051_s1 + $0x2e0] sm:$0xff]  ;;  %v126_v28 = vld [vmem:[%s3051_s1 + $0x2f8] sm:$0xff] }
  0x3e   :  { %1371 = vmatpush1.bf16.msra.mxu1 %v1370_v56  ;;  %v1454_v56 = vpack.c.bf16 %v244_v50, %v241_v47  ;;  %v72_v25 = vld [vmem:[%s3051_s1 + $0x148] sm:$0xff]  ;;  %v266_v30 = vld [vmem:[%s3051_s1 + $0x758] sm:$0xff]  ;;  %v269_v31 = vld [vmem:[%s3051_s1 + $0x770] sm:$0xff] }
  0x3f   :  { %1435 = vmatpush1.bf16.msra.mxu0 %v1434_v57  ;;  %1373 = vmatprep.subr.bf16.mxu1 %v1372_v58  ;;  %v1584_v57 = vpack.c.bf16 %v108_v52, %v105_v51  ;;  %v247_v58 = vld [vmem:[%s3051_s1 + $0x6c0] sm:$0xff]  ;;  %v2367_v29 = vld [vmem:[%s3052_s0 + $0x28] sm:$0xff]  ;;  %v265_v35 = vld [vmem:[%s3051_s1 + $0x750] sm:$0xff] }
  0x40   :  { %1437 = vmatprep.subr.bf16.mxu0 %v1436_v62  ;;  %v250_v62 = vld [vmem:[%s3051_s1 + $0x6d8] sm:$0xff]  ;;  %v75_v36 = vld [vmem:[%s3051_s1 + $0x160] sm:$0xff]  ;;  %v268_v39 = vld [vmem:[%s3051_s1 + $0x768] sm:$0xff] }
  0x41   :  { %v78_v37 = vld [vmem:[%s3051_s1 + $0x178] sm:$0xff]  ;;  %v177_v40 = vld [vmem:[%s3051_s1 + $0x490] sm:$0xff]  ;;  %v180_v41 = vld [vmem:[%s3051_s1 + $0x4a8] sm:$0xff] }
  0x42   :  { %1375 = vmatpush1.bf16.msra.mxu1 %v1374_v4  ;;  %v1458_v4 = vpack.c.bf16 %v250_v62, %v247_v58  ;;  %v272_v42 = vld [vmem:[%s3051_s1 + $0x788] sm:$0xff]  ;;  %v275_v43 = vld [vmem:[%s3051_s1 + $0x7a0] sm:$0xff]  ;;  %v274_v50 = vld [vmem:[%s3051_s1 + $0x798] sm:$0xff] }
  0x43   :  { %1439 = vmatpush1.bf16.msra.mxu0 %v1438_v5  ;;  %1569 = vmatprep.subr.bf16.mxu1 %v1568_v6  ;;  %v1588_v5 = vpack.c.bf16 %v114_v0, %v111_v63  ;;  %v253_v6 = vld [vmem:[%s3051_s1 + $0x6f0] sm:$0xff]  ;;  %v271_v47 = vld [vmem:[%s3051_s1 + $0x780] sm:$0xff]  ;;  %v186_v52 = vld [vmem:[%s3051_s1 + $0x4d8] sm:$0xff] }
  0x44   :  { %1441 = vmatprep.subr.bf16.mxu0 %v1440_v10  ;;  %v256_v10 = vld [vmem:[%s3051_s1 + $0x708] sm:$0xff]  ;;  %v183_v51 = vld [vmem:[%s3051_s1 + $0x4c0] sm:$0xff]  ;;  %v278_v53 = vld [vmem:[%s3051_s1 + $0x7b8] sm:$0xff] }
  0x45   :  { %497 = vmatmul.mubr.f32.vlgmr.msra.gmra.mrb[0].mxu1 %v2216_v17  ;;  %v281_v54 = vld [vmem:[%s3051_s1 + $0x7d0] sm:$0xff]  ;;  %v135_v59 = vld [vmem:[%s3051_s1 + $0x340] sm:$0xff]  ;;  %v138_v60 = vld [vmem:[%s3051_s1 + $0x358] sm:$0xff] }
  0x46   :  { %568 = vmatmul.mubr.f32.vlgmr.msra.gmra.mrb[0].mxu0 %v2221_v18  ;;  %1571 = vmatpush3.bf16.msra.mxu1 %v1570_v20  ;;  %v259_v20 = vld [vmem:[%s3051_s1 + $0x720] sm:$0xff]  ;;  %v277_v58 = vld [vmem:[%s3051_s1 + $0x7b0] sm:$0xff]  ;;  %v280_v62 = vld [vmem:[%s3051_s1 + $0x7c8] sm:$0xff] }
  0x47   :  { %1443 = vmatpush1.bf16.msra.mxu0 %v1442_v21  ;;  %1573 = vmatprep.subr.bf16.mxu1 %v1572_v22  ;;  %v1462_v21 = vpack.c.bf16 %v256_v10, %v253_v6  ;;  %v1592_v22 = vpack.c.bf16 %v120_v12, %v117_v11  ;;  %v189_v63 = vld [vmem:[%s3051_s1 + $0x4f0] sm:$0xff]  ;;  %v192_v0 = vld [vmem:[%s3051_s1 + $0x508] sm:$0xff]  ;;  %v287_v2 = vld [vmem:[%s3051_s1 + $0x800] sm:$0xff] }
  0x48   :  { %1445 = vmatprep.subr.bf16.mxu0 %v1444_v26  ;;  %780 = vmatprep.mubr.f32.mxu1 %v2078_v16  ;;  %v51_v16 = vld [vmem:[%s3051_s1 + $0xa0] sm:$0xff]  ;;  %v1464_v26 = vpack.c.bf16 %v263_v14, %v260_v13  ;;  %v284_v1 = vld [vmem:[%s3051_s1 + $0x7e8] sm:$0xff]  ;;  %v141_v6 = vld [vmem:[%s3051_s1 + $0x370] sm:$0xff] }
  0x49   :  { %v1582_v55 = vpack.c.bf16 %v54_v48, %v51_v16  ;;  %638 = vmatprep.mubr.f32.mxu0 %v2367_v29  ;;  %v129_v16 = vld [vmem:[%s3051_s1 + $0x310] sm:$0xff]  ;;  %v132_v48 = vld [vmem:[%s3051_s1 + $0x328] sm:$0xff]  ;;  %v1480_v8 = vpack.c.bf16 %v287_v2, %v284_v1  ;;  %v198_v10 = vld [vmem:[%s3051_s1 + $0x538] sm:$0xff] }
  0x4a   :  { %1575 = vmatpush3.bf16.msra.mxu1 %v1574_v32  ;;  %v1594_v32 = vpack.c.bf16 %v72_v25, %v69_v24  ;;  %v144_v7 = vld [vmem:[%s3051_s1 + $0x388] sm:$0xff]  ;;  %v290_v11 = vld [vmem:[%s3051_s1 + $0x818] sm:$0xff]  ;;  %v293_v12 = vld [vmem:[%s3051_s1 + $0x830] sm:$0xff] }
  0x4b   :  { %1447 = vmatpush1.bf16.msra.mxu0 %v1446_v33  ;;  %1577 = vmatprep.subr.bf16.mxu1 %v1576_v34  ;;  %v1466_v33 = vpack.c.bf16 %v262_v23, %v259_v20  ;;  %v1596_v34 = vpack.c.bf16 %v126_v28, %v123_v27  ;;  %v1610_v13 = vpack.c.bf16 %v144_v7, %v141_v6  ;;  %v289_v20 = vld [vmem:[%s3051_s1 + $0x810] sm:$0xff]  ;;  %v292_v24 = vld [vmem:[%s3051_s1 + $0x828] sm:$0xff]  ;;  %v299_v28 = vld [vmem:[%s3051_s1 + $0x860] sm:$0xff] }
  0x4c   :  { %1449 = vmatprep.subr.bf16.mxu0 %v1448_v38  ;;  %v1468_v38 = vpack.c.bf16 %v269_v31, %v266_v30  ;;  %v1484_v23 = vpack.c.bf16 %v293_v12, %v290_v11  ;;  %v201_v25 = vld [vmem:[%s3051_s1 + $0x550] sm:$0xff]  ;;  %v296_v27 = vld [vmem:[%s3051_s1 + $0x848] sm:$0xff]  ;;  %v1486_v31 = vpack.c.bf16 %v292_v24, %v289_v20  ;;  %v282_v24 = vld [vmem:[%s3051_s1 + $0x7d8] sm:$0xff] }
  0x4d   :  { %v316_v7 = vld [vmem:[%s3051_s1 + $0x8e8] sm:$0xff] }
  0x4e   :  { %1579 = vmatpush3.bf16.msra.mxu1 %v1578_v44  ;;  %v1598_v44 = vpack.c.bf16 %v78_v37, %v75_v36  ;;  %v1488_v36 = vpack.c.bf16 %v299_v28, %v296_v27  ;;  %v298_v37 = vld [vmem:[%s3051_s1 + $0x858] sm:$0xff]  ;;  %v228_v20 = vld [vmem:[%s3051_s1 + $0x628] sm:$0xff]  ;;  %v2621_v27 = vld [vmem:[%s3052_s0 + $0x20] sm:$0xff] }
  0x4f   :  { %1451 = vmatpush1.bf16.msra.mxu0 %v1450_v45  ;;  %1581 = vmatprep.subr.bf16.mxu1 %v1580_v46  ;;  %v1470_v45 = vpack.c.bf16 %v268_v39, %v265_v35  ;;  %v1600_v46 = vpack.c.bf16 %v180_v41, %v177_v40  ;;  %v156_v35 = vld [vmem:[%s3051_s1 + $0x3e8] sm:$0xff]  ;;  %v210_v39 = vld [vmem:[%s3051_s1 + $0x598] sm:$0xff]  ;;  %v305_v41 = vld [vmem:[%s3051_s1 + $0x890] sm:$0xff] }
  0x50   :  { %1453 = vmatprep.subr.bf16.mxu0 %v1452_v49  ;;  %v1472_v49 = vpack.c.bf16 %v275_v43, %v272_v42  ;;  %v302_v40 = vld [vmem:[%s3051_s1 + $0x878] sm:$0xff] }
  0x52   :  { %1583 = vmatpush3.bf16.msra.mxu1 %v1582_v55  ;;  %v1602_v55 = vpack.c.bf16 %v132_v48, %v129_v16  ;;  %v1492_v16 = vpack.c.bf16 %v305_v41, %v302_v40  ;;  %v304_v48 = vld [vmem:[%s3051_s1 + $0x888] sm:$0xff]  ;;  %v335_v40 = vld [vmem:[%s3051_s1 + $0x980] sm:$0xff] }
  0x53   :  { %1455 = vmatpush1.bf16.msra.mxu0 %v1454_v56  ;;  %1585 = vmatprep.subr.bf16.mxu1 %v1584_v57  ;;  %v1474_v56 = vpack.c.bf16 %v274_v50, %v271_v47  ;;  %v1604_v57 = vpack.c.bf16 %v186_v52, %v183_v51  ;;  %v162_v47 = vld [vmem:[%s3051_s1 + $0x418] sm:$0xff]  ;;  %v216_v50 = vld [vmem:[%s3051_s1 + $0x5c8] sm:$0xff]  ;;  %v311_v52 = vld [vmem:[%s3051_s1 + $0x8c0] sm:$0xff] }
  0x54   :  { %1457 = vmatprep.subr.bf16.mxu0 %v1456_v61  ;;  %v1476_v61 = vpack.c.bf16 %v281_v54, %v278_v53  ;;  %v308_v51 = vld [vmem:[%s3051_s1 + $0x8a8] sm:$0xff] }
  0x56   :  { %1587 = vmatpush3.bf16.msra.mxu1 %v1586_v3  ;;  %v1606_v3 = vpack.c.bf16 %v138_v60, %v135_v59  ;;  %v1496_v59 = vpack.c.bf16 %v311_v52, %v308_v51  ;;  %v310_v60 = vld [vmem:[%s3051_s1 + $0x8b8] sm:$0xff]  ;;  %v341_v51 = vld [vmem:[%s3051_s1 + $0x9b0] sm:$0xff] }
  0x57   :  { %1459 = vmatpush1.bf16.msra.mxu0 %v1458_v4  ;;  %1589 = vmatprep.subr.bf16.mxu1 %v1588_v5  ;;  %v1478_v4 = vpack.c.bf16 %v280_v62, %v277_v58  ;;  %v1608_v5 = vpack.c.bf16 %v192_v0, %v189_v63  ;;  %v168_v58 = vld [vmem:[%s3051_s1 + $0x448] sm:$0xff]  ;;  %v222_v62 = vld [vmem:[%s3051_s1 + $0x5f8] sm:$0xff]  ;;  %v317_v0 = vld [vmem:[%s3051_s1 + $0x8f0] sm:$0xff] }
  0x58   :  { %1461 = vmatprep.subr.bf16.mxu0 %v1460_v9  ;;  %v195_v9 = vld [vmem:[%s3051_s1 + $0x520] sm:$0xff]  ;;  %v314_v63 = vld [vmem:[%s3051_s1 + $0x8d8] sm:$0xff] }
  0x59   :  { %v1500_v6 = vpack.c.bf16 %v317_v0, %v314_v63 }
  0x5a   :  { %1591 = vmatpush3.bf16.msra.mxu1 %v1590_v15  ;;  %v1612_v15 = vpack.c.bf16 %v198_v10, %v195_v9  ;;  %v320_v9 = vld [vmem:[%s3051_s1 + $0x908] sm:$0xff]  ;;  %v323_v10 = vld [vmem:[%s3051_s1 + $0x920] sm:$0xff] }
  0x5b   :  { %1463 = vmatpush1.bf16.msra.mxu0 %v1462_v21  ;;  %1593 = vmatprep.subr.bf16.mxu1 %v1592_v22  ;;  %v147_v21 = vld [vmem:[%s3051_s1 + $0x3a0] sm:$0xff]  ;;  %v150_v22 = vld [vmem:[%s3051_s1 + $0x3b8] sm:$0xff] }
  0x5c   :  { %1465 = vmatprep.subr.bf16.mxu0 %v1464_v26  ;;  %v204_v26 = vld [vmem:[%s3051_s1 + $0x568] sm:$0xff]  ;;  %v1614_v30 = vpack.c.bf16 %v150_v22, %v147_v21  ;;  %v1504_v21 = vpack.c.bf16 %v323_v10, %v320_v9  ;;  %v322_v22 = vld [vmem:[%s3051_s1 + $0x918] sm:$0xff] }
  0x5e   :  { %1595 = vmatpush3.bf16.msra.mxu1 %v1594_v32  ;;  %v1616_v32 = vpack.c.bf16 %v204_v26, %v201_v25  ;;  %v326_v25 = vld [vmem:[%s3051_s1 + $0x938] sm:$0xff]  ;;  %v329_v26 = vld [vmem:[%s3051_s1 + $0x950] sm:$0xff] }
  0x5f   :  { %1467 = vmatpush1.bf16.msra.mxu0 %v1466_v33  ;;  %1597 = vmatprep.subr.bf16.mxu1 %v1596_v34  ;;  %v295_v33 = vld [vmem:[%s3051_s1 + $0x840] sm:$0xff]  ;;  %v153_v34 = vld [vmem:[%s3051_s1 + $0x3d0] sm:$0xff] }
  0x60   :  { %1469 = vmatprep.subr.bf16.mxu0 %v1468_v38  ;;  %v207_v38 = vld [vmem:[%s3051_s1 + $0x580] sm:$0xff]  ;;  %v1618_v42 = vpack.c.bf16 %v156_v35, %v153_v34  ;;  %v1490_v43 = vpack.c.bf16 %v298_v37, %v295_v33  ;;  %v234_v34 = vld [vmem:[%s3051_s1 + $0x658] sm:$0xff]  ;;  %v1508_v35 = vpack.c.bf16 %v329_v26, %v326_v25  ;;  %v285_v37 = vld [vmem:[%s3051_s1 + $0x7f0] sm:$0xff] }
  0x61   :  { %v231_v33 = vld [vmem:[%s3051_s1 + $0x640] sm:$0xff] }
  0x62   :  { %1599 = vmatpush3.bf16.msra.mxu1 %v1598_v44  ;;  %v1620_v44 = vpack.c.bf16 %v210_v39, %v207_v38  ;;  %v288_v38 = vld [vmem:[%s3051_s1 + $0x808] sm:$0xff]  ;;  %v1638_v41 = vpack.c.bf16 %v234_v34, %v231_v33  ;;  %v358_v34 = vld [vmem:[%s3051_s1 + $0xa38] sm:$0xff] }
  0x63   :  { %1471 = vmatpush1.bf16.msra.mxu0 %v1470_v45  ;;  %1601 = vmatprep.subr.bf16.mxu1 %v1600_v46  ;;  %v301_v45 = vld [vmem:[%s3051_s1 + $0x870] sm:$0xff]  ;;  %v159_v46 = vld [vmem:[%s3051_s1 + $0x400] sm:$0xff]  ;;  %v332_v39 = vld [vmem:[%s3051_s1 + $0x968] sm:$0xff] }
  0x64   :  { %1473 = vmatprep.subr.bf16.mxu0 %v1472_v49  ;;  %v213_v49 = vld [vmem:[%s3051_s1 + $0x5b0] sm:$0xff]  ;;  %v1622_v53 = vpack.c.bf16 %v162_v47, %v159_v46  ;;  %v1494_v54 = vpack.c.bf16 %v304_v48, %v301_v45  ;;  %v240_v46 = vld [vmem:[%s3051_s1 + $0x688] sm:$0xff]  ;;  %v1512_v47 = vpack.c.bf16 %v335_v40, %v332_v39  ;;  %v291_v48 = vld [vmem:[%s3051_s1 + $0x820] sm:$0xff] }
  0x65   :  { %781 = vmatmul.mubr.f32.vlgmr.msra.gmra.mrb[2].mxu1 %v2216_v17  ;;  %v283_v17 = vld [vmem:[%s3051_s1 + $0x7e0] sm:$0xff]  ;;  %v237_v45 = vld [vmem:[%s3051_s1 + $0x670] sm:$0xff] }
  0x66   :  { %1603 = vmatpush3.bf16.msra.mxu1 %v1602_v55  ;;  %850 = vmatprep.mubr.f32.mxu1 %v2090_v19  ;;  %v286_v19 = vld [vmem:[%s3051_s1 + $0x7f8] sm:$0xff]  ;;  %v1624_v55 = vpack.c.bf16 %v216_v50, %v213_v49  ;;  %v1642_v52 = vpack.c.bf16 %v240_v46, %v237_v45  ;;  %v364_v46 = vld [vmem:[%s3051_s1 + $0xa68] sm:$0xff] }
  0x67   :  { %1475 = vmatpush1.bf16.msra.mxu0 %v1474_v56  ;;  %1605 = vmatprep.subr.bf16.mxu1 %v1604_v57  ;;  %v1482_v14 = vpack.c.bf16 %v286_v19, %v283_v17  ;;  %v307_v56 = vld [vmem:[%s3051_s1 + $0x8a0] sm:$0xff]  ;;  %v165_v57 = vld [vmem:[%s3051_s1 + $0x430] sm:$0xff]  ;;  %v174_v17 = vld [vmem:[%s3051_s1 + $0x478] sm:$0xff] }
  0x68   :  { %1477 = vmatprep.subr.bf16.mxu0 %v1476_v61  ;;  %v219_v61 = vld [vmem:[%s3051_s1 + $0x5e0] sm:$0xff]  ;;  %v1626_v1 = vpack.c.bf16 %v168_v58, %v165_v57  ;;  %v1498_v2 = vpack.c.bf16 %v310_v60, %v307_v56  ;;  %v276_v19 = vld [vmem:[%s3051_s1 + $0x7a8] sm:$0xff]  ;;  %v294_v49 = vld [vmem:[%s3051_s1 + $0x838] sm:$0xff] }
  0x69   :  { %v338_v50 = vld [vmem:[%s3051_s1 + $0x998] sm:$0xff]  ;;  %v340_v58 = vld [vmem:[%s3051_s1 + $0x9a8] sm:$0xff] }
  0x6a   :  { %1607 = vmatpush3.bf16.msra.mxu1 %v1606_v3  ;;  %v1628_v3 = vpack.c.bf16 %v222_v62, %v219_v61  ;;  %v246_v56 = vld [vmem:[%s3051_s1 + $0x6b8] sm:$0xff]  ;;  %v1516_v57 = vpack.c.bf16 %v341_v51, %v338_v50  ;;  %v300_v60 = vld [vmem:[%s3051_s1 + $0x868] sm:$0xff]  ;;  %v347_v62 = vld [vmem:[%s3051_s1 + $0x9e0] sm:$0xff] }
  0x6b   :  { %1479 = vmatpush1.bf16.msra.mxu0 %v1478_v4  ;;  %1609 = vmatprep.subr.bf16.mxu1 %v1608_v5  ;;  %v313_v4 = vld [vmem:[%s3051_s1 + $0x8d0] sm:$0xff]  ;;  %v171_v5 = vld [vmem:[%s3051_s1 + $0x460] sm:$0xff]  ;;  %v344_v61 = vld [vmem:[%s3051_s1 + $0x9c8] sm:$0xff] }
  0x6c   :  { %1481 = vmatprep.subr.bf16.mxu0 %v1480_v8  ;;  %v273_v8 = vld [vmem:[%s3051_s1 + $0x790] sm:$0xff]  ;;  %v1630_v11 = vpack.c.bf16 %v174_v17, %v171_v5  ;;  %v1502_v12 = vpack.c.bf16 %v316_v7, %v313_v4  ;;  %v252_v4 = vld [vmem:[%s3051_s1 + $0x6e8] sm:$0xff]  ;;  %v1520_v5 = vpack.c.bf16 %v347_v62, %v344_v61  ;;  %v346_v17 = vld [vmem:[%s3051_s1 + $0x9d8] sm:$0xff] }
  0x6d   :  { %v306_v7 = vld [vmem:[%s3051_s1 + $0x898] sm:$0xff] }
  0x6e   :  { %1611 = vmatpush3.bf16.msra.mxu1 %v1610_v13  ;;  %v1632_v13 = vpack.c.bf16 %v276_v19, %v273_v8  ;;  %v350_v8 = vld [vmem:[%s3051_s1 + $0x9f8] sm:$0xff]  ;;  %v353_v19 = vld [vmem:[%s3051_s1 + $0xa10] sm:$0xff] }
  0x6f   :  { %1483 = vmatpush1.bf16.msra.mxu0 %v1482_v14  ;;  %1613 = vmatprep.subr.bf16.mxu1 %v1612_v15  ;;  %v319_v14 = vld [vmem:[%s3051_s1 + $0x900] sm:$0xff]  ;;  %v225_v15 = vld [vmem:[%s3051_s1 + $0x610] sm:$0xff] }
  0x70   :  { %1485 = vmatprep.subr.bf16.mxu0 %v1484_v23  ;;  %v279_v23 = vld [vmem:[%s3051_s1 + $0x7c0] sm:$0xff]  ;;  %v1634_v28 = vpack.c.bf16 %v228_v20, %v225_v15  ;;  %v1524_v15 = vpack.c.bf16 %v353_v19, %v350_v8  ;;  %v352_v20 = vld [vmem:[%s3051_s1 + $0xa08] sm:$0xff] }
  0x72   :  { %1615 = vmatpush3.bf16.msra.mxu1 %v1614_v30  ;;  %v1506_v30 = vpack.c.bf16 %v322_v22, %v319_v14  ;;  %v258_v14 = vld [vmem:[%s3051_s1 + $0x718] sm:$0xff]  ;;  %v312_v22 = vld [vmem:[%s3051_s1 + $0x8c8] sm:$0xff] }
  0x73   :  { %1487 = vmatpush1.bf16.msra.mxu0 %v1486_v31  ;;  %1617 = vmatprep.subr.bf16.mxu1 %v1616_v32  ;;  %v1636_v31 = vpack.c.bf16 %v282_v24, %v279_v23  ;;  %v325_v32 = vld [vmem:[%s3051_s1 + $0x930] sm:$0xff]  ;;  %v356_v23 = vld [vmem:[%s3051_s1 + $0xa28] sm:$0xff]  ;;  %v359_v24 = vld [vmem:[%s3051_s1 + $0xa40] sm:$0xff] }
  0x74   :  { %1489 = vmatprep.subr.bf16.mxu0 %v1488_v36  ;;  %v328_v36 = vld [vmem:[%s3051_s1 + $0x948] sm:$0xff]  ;;  %v1528_v33 = vpack.c.bf16 %v359_v24, %v356_v23  ;;  %v385_v24 = vld [vmem:[%s3051_s1 + $0xb10] sm:$0xff] }
  0x76   :  { %1619 = vmatpush3.bf16.msra.mxu1 %v1618_v42  ;;  %v2652_v42 = vld [vmem:[%s3052_s0 + $0x38] sm:$0xff] }
  0x77   :  { %1491 = vmatpush1.bf16.msra.mxu0 %v1490_v43  ;;  %1621 = vmatprep.subr.bf16.mxu1 %v1620_v44  ;;  %v1640_v43 = vpack.c.bf16 %v288_v38, %v285_v37  ;;  %v331_v44 = vld [vmem:[%s3051_s1 + $0x960] sm:$0xff]  ;;  %v362_v37 = vld [vmem:[%s3051_s1 + $0xa58] sm:$0xff]  ;;  %v365_v38 = vld [vmem:[%s3051_s1 + $0xa70] sm:$0xff] }
  0x78   :  { %1493 = vmatprep.subr.bf16.mxu0 %v1492_v16  ;;  %v334_v16 = vld [vmem:[%s3051_s1 + $0x978] sm:$0xff]  ;;  %v1532_v45 = vpack.c.bf16 %v365_v38, %v362_v37  ;;  %v391_v38 = vld [vmem:[%s3051_s1 + $0xb40] sm:$0xff] }
  0x7a   :  { %1623 = vmatpush3.bf16.msra.mxu1 %v1622_v53  ;;  %v1514_v53 = vpack.c.bf16 %v334_v16, %v331_v44  ;;  %v270_v44 = vld [vmem:[%s3051_s1 + $0x778] sm:$0xff]  ;;  %v372_v16 = vld [vmem:[%s3051_s1 + $0xaa8] sm:$0xff] }
  0x7b   :  { %1495 = vmatpush1.bf16.msra.mxu0 %v1494_v54  ;;  %1625 = vmatprep.subr.bf16.mxu1 %v1624_v55  ;;  %v1644_v54 = vpack.c.bf16 %v294_v49, %v291_v48  ;;  %v243_v55 = vld [vmem:[%s3051_s1 + $0x6a0] sm:$0xff]  ;;  %v368_v48 = vld [vmem:[%s3051_s1 + $0xa88] sm:$0xff] }
  0x7c   :  { %1497 = vmatprep.subr.bf16.mxu0 %v1496_v59  ;;  %v297_v59 = vld [vmem:[%s3051_s1 + $0x850] sm:$0xff]  ;;  %v1646_v63 = vpack.c.bf16 %v246_v56, %v243_v55  ;;  %v371_v49 = vld [vmem:[%s3051_s1 + $0xaa0] sm:$0xff]  ;;  %v370_v56 = vld [vmem:[%s3051_s1 + $0xa98] sm:$0xff] }
  0x7d   :  { %v1536_v55 = vpack.c.bf16 %v371_v49, %v368_v48  ;;  %v397_v49 = vld [vmem:[%s3051_s1 + $0xb70] sm:$0xff] }
  0x7e   :  { %1627 = vmatpush3.bf16.msra.mxu1 %v1626_v1  ;;  %v1648_v1 = vpack.c.bf16 %v300_v60, %v297_v59  ;;  %v374_v59 = vld [vmem:[%s3051_s1 + $0xab8] sm:$0xff]  ;;  %v377_v60 = vld [vmem:[%s3051_s1 + $0xad0] sm:$0xff] }
  0x7f   :  { %1499 = vmatpush1.bf16.msra.mxu0 %v1498_v2  ;;  %1629 = vmatprep.subr.bf16.mxu1 %v1628_v3  ;;  %v343_v2 = vld [vmem:[%s3051_s1 + $0x9c0] sm:$0xff]  ;;  %v249_v3 = vld [vmem:[%s3051_s1 + $0x6d0] sm:$0xff] }
  0x80   :  { %1501 = vmatprep.subr.bf16.mxu0 %v1500_v6  ;;  %v303_v6 = vld [vmem:[%s3051_s1 + $0x880] sm:$0xff]  ;;  %v1650_v9 = vpack.c.bf16 %v252_v4, %v249_v3  ;;  %v1522_v10 = vpack.c.bf16 %v346_v17, %v343_v2  ;;  %v330_v2 = vld [vmem:[%s3051_s1 + $0x958] sm:$0xff]  ;;  %v1540_v3 = vpack.c.bf16 %v377_v60, %v374_v59  ;;  %v376_v4 = vld [vmem:[%s3051_s1 + $0xac8] sm:$0xff] }
  0x81   :  { %v384_v17 = vld [vmem:[%s3051_s1 + $0xb08] sm:$0xff]  ;;  %v403_v60 = vld [vmem:[%s3051_s1 + $0xba0] sm:$0xff] }
  0x82   :  { %1631 = vmatpush3.bf16.msra.mxu1 %v1630_v11  ;;  %v1652_v11 = vpack.c.bf16 %v306_v7, %v303_v6  ;;  %v380_v6 = vld [vmem:[%s3051_s1 + $0xae8] sm:$0xff]  ;;  %v383_v7 = vld [vmem:[%s3051_s1 + $0xb00] sm:$0xff] }
  0x83   :  { %1503 = vmatpush1.bf16.msra.mxu0 %v1502_v12  ;;  %1633 = vmatprep.subr.bf16.mxu1 %v1632_v13  ;;  %v349_v12 = vld [vmem:[%s3051_s1 + $0x9f0] sm:$0xff]  ;;  %v255_v13 = vld [vmem:[%s3051_s1 + $0x700] sm:$0xff] }
  0x84   :  { %1505 = vmatprep.subr.bf16.mxu0 %v1504_v21  ;;  %v309_v21 = vld [vmem:[%s3051_s1 + $0x8b0] sm:$0xff]  ;;  %v1654_v25 = vpack.c.bf16 %v258_v14, %v255_v13  ;;  %v1526_v26 = vpack.c.bf16 %v352_v20, %v349_v12  ;;  %v1544_v12 = vpack.c.bf16 %v383_v7, %v380_v6  ;;  %v387_v13 = vld [vmem:[%s3051_s1 + $0xb20] sm:$0xff]  ;;  %v390_v14 = vld [vmem:[%s3051_s1 + $0xb38] sm:$0xff] }
  0x85   :  { %851 = vmatmul.mubr.f32.vlgmr.msra.gmra.mrb[4].mxu1 %v2221_v18  ;;  %v1510_v18 = vpack.c.bf16 %v328_v36, %v325_v32  ;;  %v264_v32 = vld [vmem:[%s3051_s1 + $0x748] sm:$0xff]  ;;  %v318_v36 = vld [vmem:[%s3051_s1 + $0x8f8] sm:$0xff]  ;;  %v389_v20 = vld [vmem:[%s3051_s1 + $0xb30] sm:$0xff]  ;;  %v1676_v23 = vpack.c.bf16 %v390_v14, %v387_v13 }
  0x86   :  { %639 = vmatmul.mubr.f32.vlgmr.msra.gmra.mrb[0].mxu0 %v2621_v27  ;;  %1635 = vmatpush3.bf16.msra.mxu1 %v1634_v28  ;;  %v1656_v28 = vpack.c.bf16 %v312_v22, %v309_v21  ;;  %v363_v7 = vld [vmem:[%s3051_s1 + $0xa60] sm:$0xff] }
  0x87   :  { %1507 = vmatpush1.bf16.msra.mxu0 %v1506_v30  ;;  %1637 = vmatprep.subr.bf16.mxu1 %v1636_v31  ;;  %v355_v30 = vld [vmem:[%s3051_s1 + $0xa20] sm:$0xff]  ;;  %v261_v31 = vld [vmem:[%s3051_s1 + $0x730] sm:$0xff] }
  0x88   :  { %1509 = vmatprep.subr.bf16.mxu0 %v1508_v35  ;;  %920 = vmatprep.mubr.f32.mxu1 %v2367_v29  ;;  %v337_v29 = vld [vmem:[%s3051_s1 + $0x990] sm:$0xff]  ;;  %v315_v35 = vld [vmem:[%s3051_s1 + $0x8e0] sm:$0xff]  ;;  %v1658_v39 = vpack.c.bf16 %v264_v32, %v261_v31  ;;  %v1530_v40 = vpack.c.bf16 %v358_v34, %v355_v30  ;;  %v388_v30 = vld [vmem:[%s3051_s1 + $0xb28] sm:$0xff] }
  0x89   :  { %709 = vmatprep.mubr.f32.mxu0 %v2652_v42  ;;  %v1518_v0 = vpack.c.bf16 %v340_v58, %v337_v29  ;;  %v324_v29 = vld [vmem:[%s3051_s1 + $0x928] sm:$0xff]  ;;  %v378_v58 = vld [vmem:[%s3051_s1 + $0xad8] sm:$0xff]  ;;  %v393_v31 = vld [vmem:[%s3051_s1 + $0xb50] sm:$0xff] }
  0x8a   :  { %1639 = vmatpush3.bf16.msra.mxu1 %v1638_v41  ;;  %v1660_v41 = vpack.c.bf16 %v318_v36, %v315_v35  ;;  %v396_v32 = vld [vmem:[%s3051_s1 + $0xb68] sm:$0xff]  ;;  %v395_v34 = vld [vmem:[%s3051_s1 + $0xb60] sm:$0xff]  ;;  %v1550_v36 = vpack.c.bf16 %v388_v30, %v385_v24  ;;  %v1024_v30 = vld [vmem:[%s3053_s4 + $0x30] sm:$0xff] }
  0x8b   :  { %1511 = vmatpush1.bf16.msra.mxu0 %v1510_v18  ;;  %1641 = vmatprep.subr.bf16.mxu1 %v1640_v43  ;;  %v361_v18 = vld [vmem:[%s3051_s1 + $0xa50] sm:$0xff]  ;;  %v267_v43 = vld [vmem:[%s3051_s1 + $0x760] sm:$0xff]  ;;  %v1680_v37 = vpack.c.bf16 %v396_v32, %v393_v31  ;;  %v1025_v31 = vld [vmem:[%s3053_s4 + $0x38] sm:$0xff] }
  0x8c   :  { %1513 = vmatprep.subr.bf16.mxu0 %v1512_v47  ;;  %v369_v47 = vld [vmem:[%s3051_s1 + $0xa90] sm:$0xff]  ;;  %v1662_v50 = vpack.c.bf16 %v270_v44, %v267_v43  ;;  %v1534_v51 = vpack.c.bf16 %v364_v46, %v361_v18  ;;  %v394_v18 = vld [vmem:[%s3051_s1 + $0xb58] sm:$0xff]  ;;  %v399_v43 = vld [vmem:[%s3051_s1 + $0xb80] sm:$0xff]  ;;  %v1706_v32 = vpack.c.bf16 %v1025_v31, %v1024_v30 }
  0x8d   :  { %v402_v44 = vld [vmem:[%s3051_s1 + $0xb98] sm:$0xff]  ;;  %v401_v46 = vld [vmem:[%s3051_s1 + $0xb90] sm:$0xff]  ;;  %v1018_v14 = vld [vmem:[%s3053_s4] sm:$0xff] }
  0x8e   :  { %1643 = vmatpush3.bf16.msra.mxu1 %v1642_v52  ;;  %v1664_v52 = vpack.c.bf16 %v372_v16, %v369_v47  ;;  %v1554_v16 = vpack.c.bf16 %v394_v18, %v391_v38  ;;  %v1684_v48 = vpack.c.bf16 %v402_v44, %v399_v43  ;;  %v1028_v38 = vld [vmem:[%s3053_s4 + $0x50] sm:$0xff]  ;;  %v1030_v18 = vld [vmem:[%s3053_s4 + $0x60] sm:$0xff]  ;;  %v1031_v43 = vld [vmem:[%s3053_s4 + $0x68] sm:$0xff]  ;;  %v1745_v44 = vmov 0.0  }
  0x8f   :  { %1515 = vmatpush1.bf16.msra.mxu0 %v1514_v53  ;;  %1645 = vmatprep.subr.bf16.mxu1 %v1644_v54  ;;  %v367_v53 = vld [vmem:[%s3051_s1 + $0xa80] sm:$0xff]  ;;  %v321_v54 = vld [vmem:[%s3051_s1 + $0x910] sm:$0xff] }
  0x90   :  { %1517 = vmatprep.subr.bf16.mxu0 %v1516_v57  ;;  %v375_v57 = vld [vmem:[%s3051_s1 + $0xac0] sm:$0xff]  ;;  %v1666_v61 = vpack.c.bf16 %v324_v29, %v321_v54  ;;  %v1538_v62 = vpack.c.bf16 %v370_v56, %v367_v53  ;;  %v400_v53 = vld [vmem:[%s3051_s1 + $0xb88] sm:$0xff]  ;;  %v405_v54 = vld [vmem:[%s3051_s1 + $0xbb0] sm:$0xff] }
  0x91   :  { %v408_v29 = vld [vmem:[%s3051_s1 + $0xbc8] sm:$0xff]  ;;  %v407_v56 = vld [vmem:[%s3051_s1 + $0xbc0] sm:$0xff] }
  0x92   :  { %1647 = vmatpush3.bf16.msra.mxu1 %v1646_v63  ;;  %v1668_v63 = vpack.c.bf16 %v378_v58, %v375_v57  ;;  %v1558_v58 = vpack.c.bf16 %v400_v53, %v397_v49  ;;  %v1688_v59 = vpack.c.bf16 %v408_v29, %v405_v54  ;;  %v1119_v30 = vld [vmem:[%s3056_s5] ss:$0 sm:$0xff] }
  0x93   :  { %1519 = vmatpush1.bf16.msra.mxu0 %v1518_v0  ;;  %1649 = vmatprep.subr.bf16.mxu1 %v1648_v1  ;;  %v373_v0 = vld [vmem:[%s3051_s1 + $0xab0] sm:$0xff]  ;;  %v327_v1 = vld [vmem:[%s3051_s1 + $0x940] sm:$0xff] }
  0x94   :  { %1521 = vmatprep.subr.bf16.mxu0 %v1520_v5  ;;  %v381_v5 = vld [vmem:[%s3051_s1 + $0xaf0] sm:$0xff]  ;;  %v1670_v8 = vpack.c.bf16 %v330_v2, %v327_v1  ;;  %v1542_v19 = vpack.c.bf16 %v376_v4, %v373_v0  ;;  %v406_v0 = vld [vmem:[%s3051_s1 + $0xbb8] sm:$0xff]  ;;  %v411_v1 = vld [vmem:[%s3051_s1 + $0xbe0] sm:$0xff] }
  0x95   :  { %v414_v2 = vld [vmem:[%s3051_s1 + $0xbf8] sm:$0xff]  ;;  %v413_v4 = vld [vmem:[%s3051_s1 + $0xbf0] sm:$0xff] }
  0x96   :  { %1651 = vmatpush3.bf16.msra.mxu1 %v1650_v9  ;;  %v1672_v9 = vpack.c.bf16 %v384_v17, %v381_v5  ;;  %v1562_v17 = vpack.c.bf16 %v406_v0, %v403_v60  ;;  %v1692_v6 = vpack.c.bf16 %v414_v2, %v411_v1 }
  0x97   :  { %1523 = vmatpush1.bf16.msra.mxu0 %v1522_v10  ;;  %1653 = vmatprep.subr.bf16.mxu1 %v1652_v11  ;;  %v333_v10 = vld [vmem:[%s3051_s1 + $0x970] sm:$0xff]  ;;  %v336_v11 = vld [vmem:[%s3051_s1 + $0x988] sm:$0xff] }
  0x98   :  { %1525 = vmatprep.subr.bf16.mxu0 %v1524_v15  ;;  %v386_v15 = vld [vmem:[%s3051_s1 + $0xb18] sm:$0xff]  ;;  %v1674_v21 = vpack.c.bf16 %v336_v11, %v333_v10 }
  0x9a   :  { %1655 = vmatpush3.bf16.msra.mxu1 %v1654_v25  ;;  %v339_v25 = vld [vmem:[%s3051_s1 + $0x9a0] sm:$0xff] }
  0x9b   :  { %1527 = vmatpush1.bf16.msra.mxu0 %v1526_v26  ;;  %1657 = vmatprep.subr.bf16.mxu1 %v1656_v28  ;;  %v342_v26 = vld [vmem:[%s3051_s1 + $0x9b8] sm:$0xff]  ;;  %v1548_v28 = vpack.c.bf16 %v389_v20, %v386_v15  ;;  %v1019_v15 = vld [vmem:[%s3053_s4 + $0x8] sm:$0xff] }
  0x9c   :  { %1529 = vmatprep.subr.bf16.mxu0 %v1528_v33  ;;  %v392_v33 = vld [vmem:[%s3051_s1 + $0xb48] sm:$0xff]  ;;  %v1678_v35 = vpack.c.bf16 %v342_v26, %v339_v25  ;;  %v1697_v20 = vpack.c.bf16 %v1019_v15, %v1018_v14  ;;  %v1022_v25 = vld [vmem:[%s3053_s4 + $0x20] sm:$0xff] }
  0x9d   :  { %v1023_v26 = vld [vmem:[%s3053_s4 + $0x28] sm:$0xff] }
  0x9e   :  { %1659 = vmatpush3.bf16.msra.mxu1 %v1658_v39  ;;  %v345_v39 = vld [vmem:[%s3051_s1 + $0x9d0] sm:$0xff] }
  0x9f   :  { %1531 = vmatpush1.bf16.msra.mxu0 %v1530_v40  ;;  %1661 = vmatprep.subr.bf16.mxu1 %v1660_v41  ;;  %v348_v40 = vld [vmem:[%s3051_s1 + $0x9e8] sm:$0xff]  ;;  %v1552_v41 = vpack.c.bf16 %v395_v34, %v392_v33  ;;  %v1026_v33 = vld [vmem:[%s3053_s4 + $0x40] sm:$0xff] }
  0xa0   :  { %1533 = vmatprep.subr.bf16.mxu0 %v1532_v45  ;;  %v398_v45 = vld [vmem:[%s3051_s1 + $0xb78] sm:$0xff]  ;;  %v1682_v47 = vpack.c.bf16 %v348_v40, %v345_v39  ;;  %v1027_v34 = vld [vmem:[%s3053_s4 + $0x48] sm:$0xff] }
  0xa1   :  { %v1029_v39 = vld [vmem:[%s3053_s4 + $0x58] sm:$0xff] }
  0xa2   :  { %1663 = vmatpush3.bf16.msra.mxu1 %v1662_v50  ;;  %v351_v50 = vld [vmem:[%s3051_s1 + $0xa00] sm:$0xff] }
  0xa3   :  { %1535 = vmatpush1.bf16.msra.mxu0 %v1534_v51  ;;  %1665 = vmatprep.subr.bf16.mxu1 %v1664_v52  ;;  %v354_v51 = vld [vmem:[%s3051_s1 + $0xa18] sm:$0xff]  ;;  %v1556_v52 = vpack.c.bf16 %v401_v46, %v398_v45  ;;  %v1715_v45 = vpack.c.bf16 %v1031_v43, %v1030_v18  ;;  %v1032_v46 = vld [vmem:[%s3053_s4 + $0x70] sm:$0xff] }
  0xa4   :  { %1537 = vmatprep.subr.bf16.mxu0 %v1536_v55  ;;  %v404_v55 = vld [vmem:[%s3051_s1 + $0xba8] sm:$0xff]  ;;  %v1686_v57 = vpack.c.bf16 %v354_v51, %v351_v50  ;;  %v415_v51 = vld [vmem:[%s3054_s2] sm:$0x7] }
  0xa5   :  { %921 = vmatmul.mubr.f32.vlgmr.msra.gmra.mrb[6].mxu1 %v2621_v27  ;;  %v379_v27 = vld [vmem:[%s3051_s1 + $0xae0] sm:$0xff] }
  0xa6   :  { %1667 = vmatpush3.bf16.msra.mxu1 %v1666_v61  ;;  %990 = vmatprep.mubr.f32.mxu1 %v2652_v42  ;;  %v382_v42 = vld [vmem:[%s3051_s1 + $0xaf8] sm:$0xff]  ;;  %v357_v61 = vld [vmem:[%s3051_s1 + $0xa30] sm:$0xff] }
  0xa7   :  { %1539 = vmatpush1.bf16.msra.mxu0 %v1538_v62  ;;  %1669 = vmatprep.subr.bf16.mxu1 %v1668_v63  ;;  %v1546_v22 = vpack.c.bf16 %v382_v42, %v379_v27  ;;  %v360_v62 = vld [vmem:[%s3051_s1 + $0xa48] sm:$0xff]  ;;  %v1560_v63 = vpack.c.bf16 %v407_v56, %v404_v55 }
  0xa8   :  { %1541 = vmatprep.subr.bf16.mxu0 %v1540_v3  ;;  %v410_v3 = vld [vmem:[%s3051_s1 + $0xbd8] sm:$0xff]  ;;  %v1690_v5 = vpack.c.bf16 %v360_v62, %v357_v61  ;;  %v412_v27 = vld [vmem:[%s3051_s1 + $0xbe8] sm:$0xff] }
  0xaa   :  { %1671 = vmatpush3.bf16.msra.mxu1 %v1670_v8  ;;  %v366_v8 = vld [vmem:[%s3051_s1 + $0xa78] sm:$0xff] }
  0xab   :  { %1543 = vmatpush1.bf16.msra.mxu0 %v1542_v19  ;;  %1673 = vmatprep.subr.bf16.mxu1 %v1672_v9  ;;  %v1564_v19 = vpack.c.bf16 %v413_v4, %v410_v3  ;;  %v409_v9 = vld [vmem:[%s3051_s1 + $0xbd0] sm:$0xff]  ;;  %v1694_v10 = vpack.c.bf16 %v366_v8, %v363_v7 }
  0xac   :  { %1545 = vmatprep.subr.bf16.mxu0 %v1544_v12  ;;  %v1566_v11 = vpack.c.bf16 %v412_v27, %v409_v9  ;;  %v29_v12 = vld [vmem:[%s3052_s0 + $0x30] sm:$0xff] }
  0xae   :  { %1675 = vmatpush3.bf16.msra.mxu1 %v1674_v21  ;;  %v1743_v21 = vmov 0.0|0.0  }
  0xaf   :  { %1547 = vmatpush1.bf16.msra.mxu0 %v1546_v22  ;;  %1677 = vmatprep.subr.bf16.mxu1 %v1676_v23  ;;  %v1020_v22 = vld [vmem:[%s3053_s4 + $0x10] sm:$0xff]  ;;  %v1021_v23 = vld [vmem:[%s3053_s4 + $0x18] sm:$0xff] }
  0xb0   :  { %1549 = vmatprep.subr.bf16.mxu0 %v1548_v28  ;;  %v1700_v24 = vpack.c.bf16 %v1021_v23, %v1020_v22  ;;  %v1703_v28 = vpack.c.bf16 %v1023_v26, %v1022_v25  ;;  %v1013_v22 = vld [vmem:[%s3055_s3] sm:$0xff] }
  0xb2   :  { %1679 = vmatpush3.bf16.msra.mxu1 %v1678_v35  ;;  %v1709_v35 = vpack.c.bf16 %v1027_v34, %v1026_v33 }
  0xb3   :  { %1551 = vmatpush1.bf16.msra.mxu0 %v1550_v36  ;;  %1681 = vmatprep.subr.bf16.mxu1 %v1680_v37 }
  0xb4   :  { %1553 = vmatprep.subr.bf16.mxu0 %v1552_v41  ;;  %v1712_v41 = vpack.c.bf16 %v1029_v39, %v1028_v38 }
  0xb6   :  { %1683 = vmatpush3.bf16.msra.mxu1 %v1682_v47  ;;  %v1033_v47 = vld [vmem:[%s3053_s4 + $0x78] sm:$0xff] }
  0xb7   :  { %1555 = vmatpush1.bf16.msra.mxu0 %v1554_v16  ;;  %1685 = vmatprep.subr.bf16.mxu1 %v1684_v48  ;;  %v1718_v16 = vpack.c.bf16 %v1033_v47, %v1032_v46  ;;  %v417_v48 = vlaneseq }
  0xb8   :  { %1557 = vmatprep.subr.bf16.mxu0 %v1556_v52 }
  0xb9   :  { %v418_v49 = vshrl.u32 %v417_v48, 7 }
  0xba   :  { %1687 = vmatpush3.bf16.msra.mxu1 %v1686_v57 }
  0xbb   :  { %1559 = vmatpush1.bf16.msra.mxu0 %v1558_v58  ;;  %1689 = vmatprep.subr.bf16.mxu1 %v1688_v59  ;;  %v427_v50 = vsub.s32 2, %v418_v49  ;;  %v419_v61 = vsub.s32 0, %v418_v49  ;;  %v423_v62 = vsub.s32 1, %v418_v49 }
  0xbc   :  { %1561 = vmatprep.subr.bf16.mxu0 %v1560_v63 }
  0xbd   :  { %v428_v52 = vrot.slane %v415_v51, %v427_v50  ;;  %v420_v63 = vrot.slane %v415_v51, %v419_v61  ;;  %v424_v0 = vrot.slane %v415_v51, %v423_v62 }
  0xbe   :  { %1691 = vmatpush3.bf16.msra.mxu1 %v1690_v5 }
  0xbf   :  { %1563 = vmatpush1.bf16.msra.mxu0 %v1562_v17  ;;  %1693 = vmatprep.subr.bf16.mxu1 %v1692_v6 }
  0xc0   :  { %1565 = vmatprep.subr.bf16.mxu0 %v1564_v19 }
  0xc2   :  { %1695 = vmatpush3.bf16.msra.mxu1 %v1694_v10 }
  0xc3   :  { %1567 = vmatpush1.bf16.msra.mxu0 %v1566_v11  ;;  %1696 = vmatprep.subr.bf16.mxu1 %v1743_v21 }
  0xc5   :  { %991 = vmatmul.mubr.f32.vlgmr.msra.gmra.mrb[8].mxu1 %v29_v12 }
  0xc6   :  { %710 = vmatmul.mubr.f32.vlgmr.msra.gmra.mrb[0].mxu0 %v29_v12  ;;  %1698 = vmatpush3.bf16.msra.mxu1 %v1697_v20 }
  0xc7   :  { %1699 = vmatprep.subr.bf16.mxu1 %v1743_v21  ;;  %1309 = vmatprep.mubr.msk.f32.mxu1 %vm1744_vm0, %v1745_v44 }
  0xca   :  { %1701 = vmatpush3.bf16.msra.mxu1 %v1700_v24 }
  0xcb   :  { %1702 = vmatprep.subr.bf16.mxu1 %v1743_v21 }
  0xce   :  { %1704 = vmatpush3.bf16.msra.mxu1 %v1703_v28 }
  0xcf   :  { %1705 = vmatprep.subr.bf16.mxu1 %v1743_v21 }
  0xd2   :  { %1707 = vmatpush3.bf16.msra.mxu1 %v1706_v32 }
  0xd3   :  { %1708 = vmatprep.subr.bf16.mxu1 %v1743_v21 }
  0xd6   :  { %1710 = vmatpush3.bf16.msra.mxu1 %v1709_v35 }
  0xd7   :  { %1711 = vmatprep.subr.bf16.mxu1 %v1743_v21 }
  0xda   :  { %1713 = vmatpush3.bf16.msra.mxu1 %v1712_v41 }
  0xdb   :  { %1714 = vmatprep.subr.bf16.mxu1 %v1743_v21 }
  0xde   :  { %1716 = vmatpush3.bf16.msra.mxu1 %v1715_v45 }
  0xdf   :  { %1717 = vmatprep.subr.bf16.mxu1 %v1743_v21 }
  0xe2   :  { %1719 = vmatpush3.bf16.msra.mxu1 %v1718_v16 }
 0x118   :  { %v2985_v42 = vpop.f32.mrb[0].mxu1 }
 0x119   :  { %v2987_v13 = vpop.f32.mrb[1].mxu1  ;;  %v499_v1 = vadd.f32 %v2985_v42, %v420_v63 }
 0x11a   :  { %v501_v3 = vadd.f32 %v2987_v13, %v424_v0 }
 0x138   :  { %v1152_v36 = vpop.f32.mrb[2].mxu1 }
 0x139   :  { %v1153_v37 = vpop.f32.mrb[3].mxu1 }
 0x13a   :  { %v1154_v40 = vadd.f32 %v1153_v37, %v1152_v36 }
 0x13c   :  { %v783_v29 = vadd.f32 %v1154_v40, %v428_v52 }
 0x158   :  { %v1187_v53 = vpop.f32.mrb[4].mxu1 }
 0x159   :  { %v1188_v54 = vpop.f32.mrb[5].mxu1 }
 0x15a   :  { %v1189_v55 = vadd.f32 %v1188_v54, %v1187_v53 }
 0x15c   :  { %v853_v56 = vadd.f32 %v1189_v55, %v783_v29 }
 0x178   :  { %v1222_v57 = vpop.f32.mrb[6].mxu1 }
 0x179   :  { %v1223_v58 = vpop.f32.mrb[7].mxu1 }
 0x17a   :  { %v1224_v59 = vadd.f32 %v1223_v58, %v1222_v57 }
 0x17c   :  { %v923_v60 = vadd.f32 %v1224_v59, %v853_v56 }
 0x198   :  { %v1257_v2 = vpop.f32.mrb[8].mxu1 }
 0x199   :  { %v711_v4 = vpop.f32.mrb[0].mxu0  ;;  %v1258_v5 = vpop.f32.mrb[9].mxu1 }
 0x19a   :  { %v1721_v17 = vadd.f32 %v711_v4, %v499_v1  ;;  %v713_v6 = vpop.f32.mrb[1].mxu0  ;;  %v1259_v7 = vadd.f32 %v1258_v5, %v1257_v2 }
 0x19b   :  { %v1723_v8 = vadd.f32 %v713_v6, %v501_v3 }
 0x19c   :  { %v1116_v19 = vmul.f32 -1.442695, %v1721_v17  ;;  %v993_v9 = vadd.f32 %v1259_v7, %v923_v60 }
 0x19d   :  { %v1117_v10 = vmul.f32 -1.442695, %v1723_v8 }
 0x19e   :  { %1731 = vpow2.f32 %v1116_v19  ;;  %v1009_v27 = vmul.f32 1.442695, %v993_v9  ;;  %vm1008_vm1 = vcmp.gt.f32.partialorder %v993_v9, 0.0 }
 0x1a0   :  { %1733 = vpow2.f32 %v1009_v27 }
 0x1a1   :  { %1735 = vpow2.f32 %v1117_v10 }
 0x1a8   :  { %v1732_v11 = vpop.eup %1731 }
 0x1a9   :  { %v999_v12 = vadd.f32 1.0, %v1732_v11 }
 0x1aa   :  { %v1734_v42 = vpop.eup %1733 }
 0x1ab   :  { %1737 = vrcp.f32 %v999_v12  ;;  %v1118_v14 = vadd.f32 -1.0, %v1734_v42  ;;  %v1736_v15 = vpop.eup %1735 }
 0x1ac   :  { %v1005_v20 = vadd.f32 1.0, %v1736_v15 }
 0x1ad   :  { %v1012_v21 = vsel %vm1008_vm1, %v993_v9, %v1118_v14 }
 0x1ae   :  { %1739 = vrcp.f32 %v1005_v20 }
 0x1b5   :  { %v1738_v13 = vpop.eup %1737 }
 0x1b6   :  { %v1014_v23 = vmul.f32 %v1738_v13, %v1012_v21 }
 0x1b8   :  { %v1015_v24 = vadd.f32 %v1014_v23, %v1013_v22  ;;  %v1740_v25 = vpop.eup %1739 }
 0x1ba   :  { %1741 = vtanh.f32 %v1015_v24 }
 0x1c4   :  { %v1742_v26 = vpop.eup %1741 }
 0x1c5   :  { %v1017_v28 = vmul.f32 %v1742_v26, %v1740_v25 }
 0x1c7   :  { %1310 = vmatmul.mubr.f32.vlgmr.msra.gmra.mrb[10].mxu1 %v1017_v28 }
 0x29a   :  { %v1107_v31 = vpop.f32.mrb[10].mxu1 }
 0x29b   :  { %v1108_v32 = vadd.f32 %v1119_v30, %v1107_v31  ;;  %v1311_v33 = vpop.f32.mrb[11].mxu1 }
 0x29d   :  { %1111 = vst [vmem:[%s3057_s6] sm:$0xff] %v1108_v32 }

</bundles_post_ra>
